<compile_context>
chip_gen: v6e
topology: v6e:2x2x1
jax: 0.10.0
libtpu: 0.0.40
codegen_flags: <defaults>
</compile_context>

<pallas_src>
import functools

import jax
import jax.numpy as jnp
from jax import lax
from jax.experimental import pallas as pl
from jax.experimental.pallas import tpu as pltpu


# ---------------------------- Pallas kernel ----------------------------

def _freq_mlp_embed_kernel(x_ref, w1_ref, b1_ref, w2_ref, b2_ref, o_ref, *, eps):
    # x_ref: [bm, Din] bf16, w1_ref: [Din, Dout] bf16, w2_ref: [Dout, Dout] bf16,
    # b1_ref/b2_ref: [1, Dout] f32, o_ref: [bm, Dout] f32.
    x = x_ref[...]
    # linear1 + bias + ReLU  (bf16 MXU matmul, f32 accumulate)
    h = jnp.dot(x, w1_ref[...], preferred_element_type=jnp.float32) + b1_ref[...]
    h = jnp.maximum(h, 0.0)
    # linear2 + bias
    y = jnp.dot(h.astype(jnp.bfloat16), w2_ref[...],
                preferred_element_type=jnp.float32) + b2_ref[...]
    # Normalize(power=2): per-row L2 norm over the feature axis (torch dim 1 for 2-D x).
    # eps clamps the squared sum (torch would produce NaN/inf for an all-zero row).
    sumsq = jnp.sum(y * y, axis=-1, keepdims=True)
    inv_norm = lax.rsqrt(jnp.maximum(sumsq, eps))   # EUP rsqrt, off the VPU critical path
    o_ref[...] = (y * inv_norm).astype(o_ref.dtype)


def freq_mlp_embed(x, w1, b1, w2, b2, *, block_rows=512, eps=1e-12):
    """freq_MLPEmbed forward.

    x : [N, Din]               (any float dtype; cast to bf16 for the MXU)
    w1: [Din, Dout]  bf16      (linear1 weight, stored input-major = torch W.T)
    b1: [1, Dout] or [Dout] f32
    w2: [Dout, Dout] bf16      (linear2)
    b2: [1, Dout] or [Dout] f32
    returns [N, Dout] float32 with each row L2-normalized.
    """
    # TODO(synk): for a 3-D input (as used inside TF_calibration_block) torch's dim-1
    # reduction is over the middle axis and needs a per-batch variant; this port covers
    # the 2-D case the standalone module implies.
    N, Din = x.shape
    Dout = w1.shape[1]
    assert w1.shape == (Din, Dout), (w1.shape, (Din, Dout))
    assert w2.shape == (Dout, Dout), (w2.shape, (Dout, Dout))

    # These conversions are no-ops when FreqMLPEmbed pre-casts at construction time.
    if x.dtype != jnp.bfloat16:
        x = x.astype(jnp.bfloat16)
    if w1.dtype != jnp.bfloat16:
        w1 = w1.astype(jnp.bfloat16)
    if w2.dtype != jnp.bfloat16:
        w2 = w2.astype(jnp.bfloat16)
    if b1.ndim == 1:
        b1 = b1.reshape(1, Dout)
    if b2.ndim == 1:
        b2 = b2.reshape(1, Dout)
    if b1.dtype != jnp.float32:
        b1 = b1.astype(jnp.float32)
    if b2.dtype != jnp.float32:
        b2 = b2.astype(jnp.float32)

    # Row tile: as large as requested, but keep >=2 grid steps when N allows so the
    # "parallel" axis can feed both v7x TensorCores (no-op on single-TC v5e/v6e).
    bm = min(block_rows, N)
    if N >= 32 and pl.cdiv(N, bm) < 2:
        bm = ((pl.cdiv(N, 2) + 15) // 16) * 16   # multiple of 16 (bf16 sublane packing)
    grid = (pl.cdiv(N, bm),)

    flops = 2 * N * Din * Dout + 2 * N * Dout * Dout + 4 * N * Dout
    bytes_accessed = (N * Din * 2 + N * Dout * 4            # x in (bf16) + out (f32)
                      + Din * Dout * 2 + Dout * Dout * 2    # weights (bf16)
                      + 2 * Dout * 4)                       # biases (f32)

    return pl.pallas_call(
        functools.partial(_freq_mlp_embed_kernel, eps=eps),
        out_shape=jax.ShapeDtypeStruct((N, Dout), jnp.float32),
        grid=grid,
        in_specs=[
            pl.BlockSpec((bm, Din), lambda i: (i, 0)),      # row tile of activations
            pl.BlockSpec((Din, Dout), lambda i: (0, 0)),    # w1 (resident across steps)
            pl.BlockSpec((1, Dout), lambda i: (0, 0)),      # b1
            pl.BlockSpec((Dout, Dout), lambda i: (0, 0)),   # w2
            pl.BlockSpec((1, Dout), lambda i: (0, 0)),      # b2
        ],
        out_specs=pl.BlockSpec((bm, Dout), lambda i: (i, 0)),
        compiler_params=pltpu.CompilerParams(
            dimension_semantics=("parallel",),  # row tiles shard across v7x's 2 TCs
        ),
        cost_estimate=pl.CostEstimate(
            flops=int(flops),
            transcendentals=int(N),             # one rsqrt per row
            bytes_accessed=int(bytes_accessed),
        ),
    )(x, w1, b1, w2, b2)


# ---------------------------- Module port ----------------------------

def _init_linear(key, fan_in, fan_out):
    # nn.Linear default init: U(-1/sqrt(fan_in), 1/sqrt(fan_in)) for weight and bias.
    kw, kb = jax.random.split(key)
    bound = 1.0 / float(fan_in) ** 0.5
    w = jax.random.uniform(kw, (fan_in, fan_out), jnp.float32, -bound, bound)
    b = jax.random.uniform(kb, (fan_out,), jnp.float32, -bound, bound)
    return w, b


class FreqMLPEmbed:
    """Forward-only port of freq_MLPEmbed with deterministic synthetic parameters.

    Weights are stored bf16 and biases as (1, Dout) f32 at construction time so the
    per-call wrapper does no dtype/reshape work.
    """

    def __init__(self, dim_in=1024, dim_out=128, seed=0):
        k1, k2 = jax.random.split(jax.random.PRNGKey(seed))
        w1_f32, b1 = _init_linear(k1, dim_in, dim_out)
        w2_f32, b2 = _init_linear(k2, dim_out, dim_out)
        # f32 copies kept for the pure-JAX reference / validation.
        self.w1_f32, self.b1_f32 = w1_f32, b1
        self.w2_f32, self.b2_f32 = w2_f32, b2
        # Kernel-ready parameters (cast once, here — not per forward call).
        self.w1 = w1_f32.astype(jnp.bfloat16)
        self.w2 = w2_f32.astype(jnp.bfloat16)
        self.b1 = b1.reshape(1, dim_out).astype(jnp.float32)
        self.b2 = b2.reshape(1, dim_out).astype(jnp.float32)

    def __call__(self, x, *, block_rows=512):
        return freq_mlp_embed(x, self.w1, self.b1, self.w2, self.b2,
                              block_rows=block_rows)


def _reference(x, w1, b1, w2, b2):
    # Pure-JAX f32 reference (same math as the PyTorch module).
    h = jnp.maximum(x @ w1 + b1, 0.0)
    y = h @ w2 + b2
    norm = jnp.sqrt(jnp.sum(y * y, axis=1, keepdims=True))
    return y / norm


# ---------------------------- demo ----------------------------

if __name__ == "__main__":
    dim_in, dim_out = 1024, 128          # module defaults
    N = 256                              # small row count for the demo

    key = jax.random.PRNGKey(0)
    x = jax.random.normal(key, (N, dim_in), jnp.float32)

    model = FreqMLPEmbed(dim_in=dim_in, dim_out=dim_out, seed=0)
    # block_rows=128 -> grid (2,): two row tiles, so both v7x TensorCores get work even
    # at this small N. (For large N leave the default 512, or sweep 512/1024.)
    out = model(x, block_rows=128)
    jax.block_until_ready(out)

    assert out.shape == (N, dim_out), out.shape
    ref = _reference(x, model.w1_f32, model.b1_f32, model.w2_f32, model.b2_f32)
    # Tolerance covers bf16-input MXU matmuls (f32 accumulate) vs the f32 XLA reference;
    # the normalized outputs are O(0.1), so a real semantic bug would be O(0.1) off.
    max_err = float(jnp.max(jnp.abs(out - ref)))
    assert bool(jnp.allclose(out, ref, rtol=2e-2, atol=2e-2)), (
        "mismatch vs pure-JAX reference: max abs err = " + str(max_err))

    print("KERNEL_OK")
</pallas_src>

<mosaic_0001>
module attributes {stable_mosaic.version = 11 : i64} {
  func.func @_freq_mlp_embed_kernel(%arg0: i32, %arg1: memref<128x1024xbf16, #tpu.memory_space<vmem>>, %arg2: memref<1024x128xbf16, #tpu.memory_space<vmem>>, %arg3: memref<1x128xf32, #tpu.memory_space<vmem>>, %arg4: memref<128x128xbf16, #tpu.memory_space<vmem>>, %arg5: memref<1x128xf32, #tpu.memory_space<vmem>>, %arg6: memref<128x128xf32, #tpu.memory_space<vmem>>) attributes {dimension_semantics = [#tpu.dimension_semantics<parallel>], iteration_bounds = array<i64: 2>, scalar_prefetch = 0 : i64, scratch_operands = 0 : i64, tpu.core_type = #tpu.core_type<tc>, window_params = [{transform_indices = @transform_0, window_bounds = array<i64: 128, 1024>}, {pipeline_mode = #tpu.pipeline_mode<synchronous>, transform_indices = @transform_1, window_bounds = array<i64: 1024, 128>}, {pipeline_mode = #tpu.pipeline_mode<synchronous>, transform_indices = @transform_2, window_bounds = array<i64: 1, 128>}, {pipeline_mode = #tpu.pipeline_mode<synchronous>, transform_indices = @transform_3, window_bounds = array<i64: 128, 128>}, {pipeline_mode = #tpu.pipeline_mode<synchronous>, transform_indices = @transform_4, window_bounds = array<i64: 1, 128>}, {transform_indices = @transform_5, window_bounds = array<i64: 128, 128>}]} {
    %c0 = arith.constant 0 : index
    %c0_0 = arith.constant 0 : index
    %0 = vector.load %arg1[%c0, %c0_0] : memref<128x1024xbf16, #tpu.memory_space<vmem>>, vector<128x1024xbf16>
    %c0_1 = arith.constant 0 : index
    %c0_2 = arith.constant 0 : index
    %1 = vector.load %arg2[%c0_1, %c0_2] : memref<1024x128xbf16, #tpu.memory_space<vmem>>, vector<1024x128xbf16>
    %cst = arith.constant dense<0.000000e+00> : vector<128x128xf32>
    %2 = tpu.matmul %0, %1, %cst {dimension_numbers = #tpu.dot_dimension_numbers<[1], [0], [0], [1], [0, 0, 1, 1], [], []>} : vector<128x1024xbf16>, vector<1024x128xbf16>, vector<128x128xf32> -> vector<128x128xf32>
    %c0_3 = arith.constant 0 : index
    %c0_4 = arith.constant 0 : index
    %3 = vector.load %arg3[%c0_3, %c0_4] : memref<1x128xf32, #tpu.memory_space<vmem>>, vector<1x128xf32>
    %4 = vector.broadcast %3 : vector<1x128xf32> to vector<128x128xf32>
    %5 = arith.addf %2, %4 : vector<128x128xf32>
    %cst_5 = arith.constant 0.000000e+00 : f32
    %6 = vector.broadcast %cst_5 : f32 to vector<128x128xf32>
    %7 = arith.maximumf %5, %6 : vector<128x128xf32>
    %8 = arith.truncf %7 : vector<128x128xf32> to vector<128x128xbf16>
    %c0_6 = arith.constant 0 : index
    %c0_7 = arith.constant 0 : index
    %9 = vector.load %arg4[%c0_6, %c0_7] : memref<128x128xbf16, #tpu.memory_space<vmem>>, vector<128x128xbf16>
    %cst_8 = arith.constant dense<0.000000e+00> : vector<128x128xf32>
    %10 = tpu.matmul %8, %9, %cst_8 {dimension_numbers = #tpu.dot_dimension_numbers<[1], [0], [0], [1], [0, 0, 1, 1], [], []>} : vector<128x128xbf16>, vector<128x128xbf16>, vector<128x128xf32> -> vector<128x128xf32>
    %c0_9 = arith.constant 0 : index
    %c0_10 = arith.constant 0 : index
    %11 = vector.load %arg5[%c0_9, %c0_10] : memref<1x128xf32, #tpu.memory_space<vmem>>, vector<1x128xf32>
    %12 = vector.broadcast %11 : vector<1x128xf32> to vector<128x128xf32>
    %13 = arith.addf %10, %12 : vector<128x128xf32>
    %14 = arith.mulf %13, %13 : vector<128x128xf32>
    %cst_11 = arith.constant dense<0.000000e+00> : vector<128xf32>
    %15 = vector.multi_reduction <add>, %14, %cst_11 [1] : vector<128x128xf32> to vector<128xf32>
    %16 = vector.shape_cast %15 : vector<128xf32> to vector<128x1xf32>
    %cst_12 = arith.constant 9.99999996E-13 : f32
    %17 = vector.broadcast %cst_12 : f32 to vector<128x1xf32>
    %18 = arith.maximumf %16, %17 : vector<128x1xf32>
    %19 = math.rsqrt %18 : vector<128x1xf32>
    %20 = vector.broadcast %19 : vector<128x1xf32> to vector<128x128xf32>
    %21 = arith.mulf %13, %20 : vector<128x128xf32>
    %c0_13 = arith.constant 0 : index
    %c0_14 = arith.constant 0 : index
    %22 = vector.load %arg6[%c0_13, %c0_14] : memref<128x128xf32, #tpu.memory_space<vmem>>, vector<128x128xf32>
    tpu.vector_store %arg6[%c0_13, %c0_14], %21 {strides = array<i32>} : memref<128x128xf32, #tpu.memory_space<vmem>>, vector<128x128xf32>,
    return
  }
  func.func @transform_0(%arg0: i32) -> (i32, i32) {
    %c0_i32 = arith.constant 0 : i32
    %c0_i32_0 = arith.constant 0 : i32
    return %arg0, %c0_i32 : i32, i32
  }
  func.func @transform_1(%arg0: i32) -> (i32, i32) {
    %c0_i32 = arith.constant 0 : i32
    %c0_i32_0 = arith.constant 0 : i32
    %c0_i32_1 = arith.constant 0 : i32
    return %c0_i32, %c0_i32_0 : i32, i32
  }
  func.func @transform_2(%arg0: i32) -> (i32, i32) {
    %c0_i32 = arith.constant 0 : i32
    %c0_i32_0 = arith.constant 0 : i32
    %c0_i32_1 = arith.constant 0 : i32
    return %c0_i32, %c0_i32_0 : i32, i32
  }
  func.func @transform_3(%arg0: i32) -> (i32, i32) {
    %c0_i32 = arith.constant 0 : i32
    %c0_i32_0 = arith.constant 0 : i32
    %c0_i32_1 = arith.constant 0 : i32
    return %c0_i32, %c0_i32_0 : i32, i32
  }
  func.func @transform_4(%arg0: i32) -> (i32, i32) {
    %c0_i32 = arith.constant 0 : i32
    %c0_i32_0 = arith.constant 0 : i32
    %c0_i32_1 = arith.constant 0 : i32
    return %c0_i32, %c0_i32_0 : i32, i32
  }
  func.func @transform_5(%arg0: i32) -> (i32, i32) {
    %c0_i32 = arith.constant 0 : i32
    %c0_i32_0 = arith.constant 0 : i32
    return %arg0, %c0_i32 : i32, i32
  }
}

</mosaic_0001>

<bundles_post_ra>
// kernel: tpu_custom_call.1
= control target key start
LH: loop header
LB: loop body
LE: loop exit
PB: predicated region body
PF: predicated region fallthrough
CT: control target
= control target key end

     0   :  { %10 = vsyncpa [#allocation3], 0  ;;  %s3322_s0 = inlined_call_operand.hbm [shape: bf16[256,1024], index: 0, kind: input, shape index: {}]   ;;  %s3323_s1 = inlined_call_operand.hbm [shape: bf16[1024,128], index: 1, kind: input, shape index: {}]   ;;  %s3324_s2 = inlined_call_operand.vmem [shape: f32[1,128], index: 2, kind: input, shape index: {}]   ;;  %s3325_s3 = inlined_call_operand.hbm [shape: bf16[128,128], index: 3, kind: input, shape index: {}]   ;;  %s3326_s4 = inlined_call_operand.vmem [shape: f32[1,128], index: 4, kind: input, shape index: {}]   ;;  %s3327_s5 = inlined_call_operand.hbm [shape: f32[256,128], index: 5, kind: output, shape index: {}]  }
   0x1   :  { %12 = vsyncpa [#allocation3 + $0x1], 0 }
   0x2   :  { %13 = vsyncpa [#allocation6], 0 }
   0x3   :  { %14 = vsyncpa [#allocation4], 0 }
   0x4   :  { %16 = vsyncpa [#allocation4 + $0x1], 0  ;;  %s2824_s18 = smov 0   ;;  %s2826_s19 = smov 0  }
   0x5   :  { %s2828_s20 = smov 0   ;;  %s2830_s21 = smov 0  }
   0x6 LB: > { %s2845_s22 = sadd.s32 4294967295, %s2782_s21   ;;  %s1977_s23 = sadd.s32 4294967294, %s2782_s21   ;;  %s2782_s21 = sphi %s2830_s21, %s3349_s21   ;;  %s2778_s20 = sphi %s2828_s20, %s3348_s20   ;;  %s2774_s19 = sphi %s2826_s19, %s3347_s19   ;;  %s2770_s18 = sphi %s2824_s18, %s3346_s18  }
   0x7   : > { %p42_p0 = scmp.ne.s32.totalorder %s2774_s19, %s2770_s18  ;;  %p3328_p1 = scmp.eq.s32.totalorder %s2845_s22, 0 }
   0x8   : > { %p156_p3 = scmp.eq.s32.totalorder %s1977_s23, 1  ;;  %p1978_p5 = scmp.ge.s32.totalorder %s2782_s21, 1 }
   0x9   : > { %p2854_p4 = por %p3328_p1, %p42_p0  ;;  %p163_p7 = scmp.lt.s32.totalorder %s2782_s21, 3 }
   0xa   : > { %p2859_p6 = por %p156_p3, %p42_p0  ;;  %s2784_s27 = smov [#allocation5]  }
   0xb   : > { %s3332_s24 = scalar_select %p2854_p4, 1, 0 }
   0xc   : > { %s3333_s25 = scalar_select %p2859_p6, 1, 0 }
   0xd   : > { %p2864_p8 = pnand %p1978_p5, %p163_p7  ;;  %s175_s28 = sshll.u32 %s2784_s27, 4  ;;  %s176_s28 = int_to_ptr.vmem [resolvable:$true] %s175_s28 }
   0xe   : > { %s2785_s30 = smov [#allocation7]   ;;  %s2645_s7 = scalar_lea.vmem %s176_s28, 8192 }
   0xf   : > { %s3334_s26 = scalar_select %p2864_p8, 1, 0 }
  0x10   : > { %p2469_p9 = pneg %p2864_p8  ;;  %s191_s6 = sshll.u32 %s2785_s30, 4  ;;  %s192_s6 = int_to_ptr.vmem [resolvable:$true] %s191_s6 }
  0x11   : > { %p2646_p13 = scmp.ne.s32.totalorder %s176_s28, %s2645_s7  ;;  %p2653_p5 = scmp.lt.s32.totalorder %s176_s28, %s176_s28 }
  0x12   : > { %p2873_p11 = pnand %p2469_p9, %p3328_p1  ;;  %p2654_p7 = scmp.lt.s32.totalorder %s2645_s7, %s2645_s7 }
  0x14   : > { %p2636_p12 = pneg %p2873_p11  ;;  %p2655_p10 = por %p2654_p7, %p2653_p5 }
  0x16   : > { %p2648_p0 = pnand %p2646_p13, %p2636_p12 }
  0x18   : > { %p2649_p3 = pneg %p2648_p0 }
  0x1a   : > { %p2656_p9 = pnand %p2655_p10, %p2649_p3 }
  0x1c   : > { %2659 = shalt.err (!%p2656_p9)
}
  0x1d   : > { %s2786_s8 = smov 64   ;;  %s2787_s9 = smov 4  }
  0x1e   : > { %2472 = dma.hbm_to_vmem [thread:$0]  (!%p2873_p11), %s3323_s1, 8192, %s176_s28, [#allocation6], %s2786_s8, %s2786_s8, %s2787_s9  }
  0x1f   : > { %s2671_s12 = scalar_lea.vmem %s192_s6, 1024  ;;  %p2679_p2 = scmp.lt.s32.totalorder %s192_s6, %s192_s6 }
  0x20   : > { %p2672_p1 = scmp.ne.s32.totalorder %s192_s6, %s2671_s12  ;;  %p2680_p6 = scmp.lt.s32.totalorder %s2671_s12, %s2671_s12 }
  0x22   : > { %p2674_p13 = pnand %p2672_p1, %p2636_p12  ;;  %p2681_p5 = por %p2680_p6, %p2679_p2 }
  0x24   : > { %p2675_p0 = pneg %p2674_p13 }
  0x26   : > { %p2682_p10 = pnand %p2681_p5, %p2675_p0 }
  0x28   : > { %2685 = shalt.err (!%p2682_p10)
}
  0x29   : > { %2475 = dma.hbm_to_vmem [thread:$0]  (!%p2873_p11), %s3325_s3, 1024, %s192_s6, [#allocation6], %s2786_s8, %s2786_s8, %s2787_s9  }
  0x2a   : > { %s2896_s15 = sadd.s32 1, %s2782_s21   ;;  %s29_s16 = sadd.s32 1, %s2778_s20 }
  0x2b   : > { %s26_s17 = ssub.s32 %s2782_s21, %s2896_s15  ;;  %p36_p1 = scmp.ne.s32.totalorder %s2778_s20, %s2774_s19 }
  0x2c   : > { %p27_p2 = scmp.eq.s32.totalorder %s26_s17, 0  ;;  %p37_p6 = scmp.eq.s32.totalorder %s2782_s21, 0 }
  0x2d   : > { %p3336_p12 = scmp.eq.s32.totalorder %s2845_s22, 1  ;;  %p2486_p7 = scmp.lt.s32.totalorder %s2782_s21, 2 }
  0x2e   : > { %s2912_s27 = scalar_select %p27_p2, %s2778_s20, %s29_s16  }
  0x2f   : > { %p2906_p3 = por %p3336_p12, %p36_p1  ;;  %p38_p9 = por %p37_p6, %p36_p1 }
  0x30   : > { %s208_s28 = sand.u32 1, %s2778_s20   ;;  %s2135_s30 = sshll.u32 %s2782_s21, 13 }
  0x31   : > { %s3337_s23 = scalar_select %p2906_p3, 1, 0 }
  0x32   : > { %s1982_s29 = sshll.u32 %s208_s28, 9  ;;  %s2919_s8 = scalar_lea.hbm %s3322_s0, %s2135_s30 }
  0x33   : > { %s212_s9 = scalar_lea.vmem [#allocation2], %s1982_s29  ;;  %p2923_p11 = pnand %p2486_p7, %p38_p9 }
  0x34   : > { %s220_s10 = sshll.u32 %s212_s9, 4  ;;  %s2927_s12 = scalar_lea.sflag [#allocation3], %s208_s28  ;;  %s2921_s10 = int_to_ptr.vmem [resolvable:$true] %s220_s10 }
  0x35   : > { %s2686_s13 = scalar_lea.hbm %s2919_s8, 8192  ;;  %p2688_p0 = pneg %p2923_p11 }
  0x36   : > { %p2687_p13 = scmp.ne.s32.totalorder %s2919_s8, %s2686_s13  ;;  %s2691_s17 = scalar_lea.hbm %s3322_s0, 16384 }
  0x37   : > { %p2692_p1 = scmp.lt.s32.totalorder %s2919_s8, %s3322_s0  ;;  %p2693_p2 = scmp.lt.s32.totalorder %s2691_s17, %s2686_s13 }
  0x38   : > { %p2689_p5 = pnand %p2688_p0, %p2687_p13 }
  0x39   : > { %p2694_p6 = por %p2693_p2, %p2692_p1 }
  0x3a   : > { %p2690_p10 = pneg %p2689_p5 }
  0x3c   : > { %p2695_p12 = pnand %p2694_p6, %p2690_p10 }
  0x3e   : > { %2698 = shalt.err (!%p2695_p12)
}
  0x3f   : > { %s2699_s28 = scalar_lea.vmem %s2921_s10, 8192  ;;  %s2788_s6 = smov [#allocation2]  }
  0x40   : > { %p2700_p7 = scmp.ne.s32.totalorder %s2921_s10, %s2699_s28  ;;  %s2704_s7 = sshll.u32 %s2788_s6, 4  ;;  %s2705_s7 = int_to_ptr.vmem [resolvable:$false] %s2704_s7 }
  0x41   : > { %s2706_s9 = scalar_lea.vmem %s2705_s7, 16384  ;;  %p2707_p5 = scmp.lt.s32.totalorder %s2921_s10, %s2705_s7 }
  0x42   : > { %p2702_p9 = pnand %p2700_p7, %p2688_p0  ;;  %p2708_p3 = scmp.lt.s32.totalorder %s2706_s9, %s2699_s28 }
  0x44   : > { %p2703_p13 = pneg %p2702_p9  ;;  %p2709_p4 = por %p2708_p3, %p2707_p5 }
  0x46   : > { %p2710_p8 = pnand %p2709_p4, %p2703_p13 }
  0x48   : > { %2713 = shalt.err (!%p2710_p8)
}
  0x49   : > { %s2789_s13 = smov 512   ;;  %s2790_s14 = smov 32  }
  0x4a   : > { %2479 = dma.hbm_to_vmem [thread:$0]  (!%p2923_p11), %s2919_s8, 8192, %s2921_s10, %s2927_s12, %s2789_s13, %s2789_s13, %s2790_s14  }
  0x4b   : > { %p3339_p0 = scmp.ne.s32.totalorder %s3334_s26, 0 }
  0x4c   : > { %s2951_s16 = sand.u32 (!%p3339_p0), 1, %s2774_s19   ;;  %p3340_p4 = scmp.ne.s32.totalorder (!%p3339_p0), %s3332_s24, 0 }
  0x4d   : > { %232 = sbr.rel (%p3339_p0) target bundleno = 826 (0x33a), region = 40  ;;  %s1987_s17 = sshll.u32 (!%p3339_p0), %s2951_s16, 9 }
  0x4e   : > { %s235_s29 = scalar_lea.sflag (!%p3339_p0), [#allocation3], %s2951_s16  ;;  %s2955_s30 = scalar_lea.vmem (!%p3339_p0), [#allocation2], %s1987_s17 }
  0x52   : > { %2757 = dma.done.wait (%p3340_p4), %s235_s29, 8192  }
  0x53   : > { %2759 = vsyncadd (%p3340_p4), %s235_s29, 4294959104  ;;  %p3341_p8 = scmp.eq.s32.totalorder %s2845_s22, 0 }
  0x55   : > { %2761 = dma.done.wait (%p3341_p8), [#allocation6], 9216   ;;  %p3342_p3 = pmov %p3341_p8 }
  0x56   : > { %v2530_v0 = vld [vmem:[#allocation5 + $0x78] sm:$0xff]   ;;  %v2534_v4 = vld [vmem:[#allocation5 + $0x70] sm:$0xff]   ;;  %v2538_v8 = vld [vmem:[#allocation5 + $0x68] sm:$0xff]   ;;  %s1990_s11 = sshll.u32 %s2951_s16, 7  ;;  %s2136_s28 = sshll.u32 %s2845_s22, 11 }
  0x57   : > { %2763 = vsyncadd (%p3342_p3), [#allocation6], 4294958080  ;;  %v2531_v1 = vld [vmem:[#allocation5 + $0xf8] sm:$0xff]   ;;  %2137 = vmatprep.subr.bf16.mxu0 %v2530_v0  ;;  %v2535_v5 = vld [vmem:[#allocation5 + $0xf0] sm:$0xff]   ;;  %s3239_s12 = scalar_lea.vmem [#allocation8], %s1990_s11  ;;  %s3275_s13 = scalar_lea.hbm %s3327_s5, %s2136_s28 }
  0x58   : > { %v2532_v2 = vld [vmem:[#allocation5 + $0x38] sm:$0xff]   ;;  %2201 = vmatprep.subr.bf16.mxu1 %v2531_v1  ;;  %v2536_v6 = vld [vmem:[#allocation5 + $0x30] sm:$0xff]   ;;  %v2539_v9 = vld [vmem:[#allocation5 + $0xe8] sm:$0xff]   ;;  %s1885_s6 = sshll.u32 %s3239_s12, 4  ;;  %s1872_s22 = scalar_lea.sflag [#allocation4], %s2951_s16  ;;  %s3277_s6 = int_to_ptr.vmem [resolvable:$true] %s1885_s6 }
  0x59   : > { %v2533_v3 = vld [vmem:[#allocation5 + $0xb8] sm:$0xff]   ;;  %2138 = vmatpush3.bf16.msra.mxu0 %v2532_v2  ;;  %v2537_v7 = vld [vmem:[#allocation5 + $0xb0] sm:$0xff]   ;;  %v2540_v10 = vld [vmem:[#allocation5 + $0x28] sm:$0xff]   ;;  %s2714_s14 = scalar_lea.vmem %s3277_s6, 2048  ;;  %p3343_p10 = scmp.ne.s32.totalorder %s3337_s23, 0 }
  0x5a   : > { %2202 = vmatpush3.bf16.msra.mxu1 %v2533_v3  ;;  %2139 = vmatprep.subr.bf16.mxu0 %v2534_v4  ;;  %v2541_v11 = vld [vmem:[#allocation5 + $0xa8] sm:$0xff]   ;;  %v2542_v12 = vld [vmem:[#allocation5 + $0x60] sm:$0xff]   ;;  %v2546_v16 = vld [vmem:[#allocation5 + $0x58] sm:$0xff]   ;;  %p2715_p11 = scmp.ne.s32.totalorder %s3277_s6, %s2714_s14  ;;  %s2791_s17 = smov [#allocation8]  }
  0x5b   : > { %2203 = vmatprep.subr.bf16.mxu1 %v2535_v5  ;;  %v2543_v13 = vld [vmem:[#allocation5 + $0xe0] sm:$0xff]   ;;  %v2547_v17 = vld [vmem:[#allocation5 + $0xd8] sm:$0xff]   ;;  %v2550_v20 = vld [vmem:[#allocation5 + $0x50] sm:$0xff]   ;;  %s2718_s29 = sshll.u32 %s2791_s17, 4  ;;  %s2719_s29 = int_to_ptr.vmem [resolvable:$false] %s2718_s29 }
  0x5c   : > { %v2544_v14 = vld [vmem:[#allocation5 + $0x20] sm:$0xff]   ;;  %v2548_v18 = vld [vmem:[#allocation5 + $0x18] sm:$0xff]   ;;  %v2551_v21 = vld [vmem:[#allocation5 + $0xd0] sm:$0xff]   ;;  %p2716_p1 = pnand %p2715_p11, %p3343_p10  ;;  %p2721_p6 = scmp.lt.s32.totalorder %s3277_s6, %s2719_s29 }
  0x5d   : > { %2140 = vmatpush3.bf16.msra.mxu0 %v2536_v6  ;;  %v2545_v15 = vld [vmem:[#allocation5 + $0xa0] sm:$0xff]   ;;  %v2549_v19 = vld [vmem:[#allocation5 + $0x98] sm:$0xff]   ;;  %v2552_v22 = vld [vmem:[#allocation5 + $0x10] sm:$0xff]  }
  0x5e   : > { %2204 = vmatpush3.bf16.msra.mxu1 %v2537_v7  ;;  %2141 = vmatprep.subr.bf16.mxu0 %v2538_v8  ;;  %v2553_v23 = vld [vmem:[#allocation5 + $0x90] sm:$0xff]   ;;  %v2554_v24 = vld [vmem:[#allocation5 + $0x48] sm:$0xff]   ;;  %v2558_v28 = vld [vmem:[#allocation5 + $0x40] sm:$0xff]   ;;  %p2717_p2 = pneg %p2716_p1 }
  0x5f   : > { %2205 = vmatprep.subr.bf16.mxu1 %v2539_v9  ;;  %v2555_v25 = vld [vmem:[#allocation5 + $0xc8] sm:$0xff]   ;;  %v2559_v29 = vld [vmem:[#allocation5 + $0xc0] sm:$0xff]   ;;  %v2562_v40 = vld [vmem:[#allocation5 + $0x178] sm:$0xff]  }
  0x60   : > { %v2556_v26 = vld [vmem:[#allocation5 + $0x8] sm:$0xff]   ;;  %v2560_v30 = vld [vmem:[#allocation5] sm:$0xff]   ;;  %v2563_v41 = vld [vmem:[#allocation5 + $0x138] sm:$0xff]  }
  0x61   : > { %2142 = vmatpush3.bf16.msra.mxu0 %v2540_v10  ;;  %v2557_v27 = vld [vmem:[#allocation5 + $0x88] sm:$0xff]   ;;  %v2561_v31 = vld [vmem:[#allocation5 + $0x80] sm:$0xff]   ;;  %v2564_v42 = vld [vmem:[#allocation5 + $0x1f8] sm:$0xff]  }
  0x62   : > { %2206 = vmatpush3.bf16.msra.mxu1 %v2541_v11  ;;  %2143 = vmatprep.subr.bf16.mxu0 %v2542_v12  ;;  %v276_v32 = vld [vmem:[%s2955_s30] sm:$0xff]  ;;  %v277_v34 = vld [vmem:[%s2955_s30 + $0x8] sm:$0xff]  ;;  %v2565_v43 = vld [vmem:[#allocation5 + $0x1b8] sm:$0xff]  }
  0x63   : > { %2207 = vmatprep.subr.bf16.mxu1 %v2543_v13  ;;  %v280_v33 = vld [vmem:[%s2955_s30 + $0x20] sm:$0xff]  ;;  %v281_v37 = vld [vmem:[%s2955_s30 + $0x28] sm:$0xff]  ;;  %v2566_v50 = vld [vmem:[#allocation5 + $0x170] sm:$0xff]  }
  0x64   : > { %v1992_v35 = vcombine.low %v276_v32, %v280_v33  ;;  %v1993_v36 = vcombine.high %v276_v32, %v280_v33  ;;  %v1994_v38 = vcombine.low %v277_v34, %v281_v37  ;;  %v1995_v39 = vcombine.high %v277_v34, %v281_v37  ;;  %v284_v44 = vld [vmem:[%s2955_s30 + $0x40] sm:$0xff]  ;;  %v285_v47 = vld [vmem:[%s2955_s30 + $0x48] sm:$0xff]  ;;  %v2567_v52 = vld [vmem:[#allocation5 + $0x130] sm:$0xff]  }
  0x65   : > { %2144 = vmatpush3.bf16.msra.mxu0 %v2544_v14  ;;  %v288_v45 = vld [vmem:[%s2955_s30 + $0x60] sm:$0xff]  ;;  %v289_v48 = vld [vmem:[%s2955_s30 + $0x68] sm:$0xff]  ;;  %v2568_v54 = vld [vmem:[#allocation5 + $0x1f0] sm:$0xff]  }
  0x66   : > { %2208 = vmatpush3.bf16.msra.mxu1 %v2545_v15  ;;  %2145 = vmatprep.subr.bf16.mxu0 %v2546_v16  ;;  %v2001_v46 = vcombine.high %v284_v44, %v288_v45  ;;  %v2003_v49 = vcombine.high %v285_v47, %v289_v48  ;;  %v2000_v51 = vcombine.low %v284_v44, %v288_v45  ;;  %v2569_v55 = vld [vmem:[#allocation5 + $0x1b0] sm:$0xff]   ;;  %v292_v56 = vld [vmem:[%s2955_s30 + $0x80] sm:$0xff]  ;;  %v293_v58 = vld [vmem:[%s2955_s30 + $0x88] sm:$0xff] }
  0x67   : > { %2209 = vmatprep.subr.bf16.mxu1 %v2547_v17  ;;  %1211 = vmatprep.mubr.bf16.mxu0 %v1993_v36  ;;  %v2002_v53 = vcombine.low %v285_v47, %v289_v48  ;;  %v296_v57 = vld [vmem:[%s2955_s30 + $0xa0] sm:$0xff]  ;;  %v297_v59 = vld [vmem:[%s2955_s30 + $0xa8] sm:$0xff]  ;;  %v2584_v32 = vld [vmem:[#allocation5 + $0x1d0] sm:$0xff]  }
  0x68   : > { %1308 = vmatprep.mubr.bf16.mxu1 %v1995_v39  ;;  %v2009_v60 = vcombine.high %v292_v56, %v296_v57  ;;  %v2011_v61 = vcombine.high %v293_v58, %v297_v59  ;;  %v2570_v62 = vld [vmem:[#allocation5 + $0x168] sm:$0xff]   ;;  %v2008_v2 = vcombine.low %v292_v56, %v296_v57  ;;  %v300_v3 = vld [vmem:[%s2955_s30 + $0xc0] sm:$0xff]  ;;  %v2010_v6 = vcombine.low %v293_v58, %v297_v59  ;;  %v2585_v33 = vld [vmem:[#allocation5 + $0x190] sm:$0xff]  }
  0x69   : > { %2146 = vmatpush3.bf16.msra.mxu0 %v2548_v18  ;;  %v2571_v63 = vld [vmem:[#allocation5 + $0x128] sm:$0xff]   ;;  %v304_v4 = vld [vmem:[%s2955_s30 + $0xe0] sm:$0xff]  ;;  %v2578_v18 = vld [vmem:[#allocation5 + $0x158] sm:$0xff]  }
  0x6a   : > { %2210 = vmatpush3.bf16.msra.mxu1 %v2549_v19  ;;  %2147 = vmatprep.subr.bf16.mxu0 %v2550_v20  ;;  %v2572_v0 = vld [vmem:[#allocation5 + $0x1e8] sm:$0xff]   ;;  %v2017_v7 = vcombine.high %v300_v3, %v304_v4  ;;  %v2574_v10 = vld [vmem:[#allocation5 + $0x160] sm:$0xff]   ;;  %v2016_v19 = vcombine.low %v300_v3, %v304_v4  ;;  %v2579_v20 = vld [vmem:[#allocation5 + $0x118] sm:$0xff]  }
  0x6b   : > { %2211 = vmatprep.subr.bf16.mxu1 %v2551_v21  ;;  %v2573_v1 = vld [vmem:[#allocation5 + $0x1a8] sm:$0xff]   ;;  %v2575_v11 = vld [vmem:[#allocation5 + $0x120] sm:$0xff]  }
  0x6c   : > { %v301_v5 = vld [vmem:[%s2955_s30 + $0xc8] sm:$0xff]  ;;  %v2576_v12 = vld [vmem:[#allocation5 + $0x1e0] sm:$0xff]  }
  0x6d   : > { %2148 = vmatpush3.bf16.msra.mxu0 %v2552_v22  ;;  %v305_v8 = vld [vmem:[%s2955_s30 + $0xe8] sm:$0xff]  ;;  %v2577_v13 = vld [vmem:[#allocation5 + $0x1a0] sm:$0xff]  }
  0x6e   : > { %2212 = vmatpush3.bf16.msra.mxu1 %v2553_v23  ;;  %2149 = vmatprep.subr.bf16.mxu0 %v2554_v24  ;;  %v2019_v9 = vcombine.high %v301_v5, %v305_v8  ;;  %v308_v14 = vld [vmem:[%s2955_s30 + $0x100] sm:$0xff]  ;;  %v309_v16 = vld [vmem:[%s2955_s30 + $0x108] sm:$0xff]  ;;  %v2018_v21 = vcombine.low %v301_v5, %v305_v8  ;;  %v2580_v23 = vld [vmem:[#allocation5 + $0x1d8] sm:$0xff]  }
  0x6f   : > { %2213 = vmatprep.subr.bf16.mxu1 %v2555_v25  ;;  %v312_v15 = vld [vmem:[%s2955_s30 + $0x120] sm:$0xff]  ;;  %v313_v17 = vld [vmem:[%s2955_s30 + $0x128] sm:$0xff]  ;;  %v2581_v25 = vld [vmem:[#allocation5 + $0x198] sm:$0xff]  }
  0x70   : > { %v2025_v22 = vcombine.high %v308_v14, %v312_v15  ;;  %v2027_v24 = vcombine.high %v309_v16, %v313_v17  ;;  %v2024_v34 = vcombine.low %v308_v14, %v312_v15  ;;  %v2587_v39 = vld [vmem:[#allocation5 + $0x108] sm:$0xff]   ;;  %v2591_v48 = vld [vmem:[#allocation5 + $0x100] sm:$0xff]   ;;  %v287_v8 = vld [vmem:[%s2955_s30 + $0x58] sm:$0xff] }
  0x71   : > { %2150 = vmatpush3.bf16.msra.mxu0 %v2556_v26  ;;  %v316_v26 = vld [vmem:[%s2955_s30 + $0x140] sm:$0xff]  ;;  %v325_v44 = vld [vmem:[%s2955_s30 + $0x188] sm:$0xff]  ;;  %v294_v14 = vld [vmem:[%s2955_s30 + $0x90] sm:$0xff] }
  0x72   : > { %2214 = vmatpush3.bf16.msra.mxu1 %v2557_v27  ;;  %2151 = vmatprep.subr.bf16.mxu0 %v2558_v28  ;;  %v320_v27 = vld [vmem:[%s2955_s30 + $0x160] sm:$0xff]  ;;  %v2582_v28 = vld [vmem:[#allocation5 + $0x150] sm:$0xff]   ;;  %v329_v45 = vld [vmem:[%s2955_s30 + $0x1a8] sm:$0xff] }
  0x73   : > { %2215 = vmatprep.subr.bf16.mxu1 %v2559_v29  ;;  %v317_v29 = vld [vmem:[%s2955_s30 + $0x148] sm:$0xff]  ;;  %v2033_v36 = vcombine.high %v316_v26, %v320_v27  ;;  %v2032_v47 = vcombine.low %v316_v26, %v320_v27  ;;  %v2042_v59 = vcombine.low %v325_v44, %v329_v45  ;;  %v298_v15 = vld [vmem:[%s2955_s30 + $0xb0] sm:$0xff] }
  0x74   : > { %v333_v56 = vld [vmem:[%s2955_s30 + $0x1c8] sm:$0xff]  ;;  %v2012_v26 = vcombine.low %v294_v14, %v298_v15 }
  0x75   : > { %2152 = vmatpush3.bf16.msra.mxu0 %v2560_v30  ;;  %v321_v30 = vld [vmem:[%s2955_s30 + $0x168] sm:$0xff] }
  0x76   : > { %2216 = vmatpush3.bf16.msra.mxu1 %v2561_v31  ;;  %2265 = vmatprep.subr.bf16.mxu0 %v2562_v40  ;;  %v2583_v31 = vld [vmem:[#allocation5 + $0x110] sm:$0xff]   ;;  %v2035_v37 = vcombine.high %v317_v29, %v321_v30  ;;  %v2588_v40 = vld [vmem:[#allocation5 + $0x1c8] sm:$0xff]  }
  0x77   : > { %2329 = vmatprep.subr.bf16.mxu1 %v2564_v42  ;;  %v328_v42 = vld [vmem:[%s2955_s30 + $0x1a0] sm:$0xff]  ;;  %v337_v57 = vld [vmem:[%s2955_s30 + $0x1e8] sm:$0xff] }
  0x78   : > { %1212 = vmatmul.mubr.bf16.vlgmr.msra.gmra.mxu0 %v1992_v35  ;;  %v2026_v35 = vcombine.low %v309_v16, %v313_v17  ;;  %v2050_v3 = vcombine.low %v333_v56, %v337_v57  ;;  %v295_v16 = vld [vmem:[%s2955_s30 + $0x98] sm:$0xff] }
  0x79   : > { %1309 = vmatmul.mubr.bf16.vlgmr.msra.gmra.mxu1 %v1994_v38  ;;  %2266 = vmatpush3.bf16.msra.mxu0 %v2563_v41  ;;  %v2586_v38 = vld [vmem:[#allocation5 + $0x148] sm:$0xff]   ;;  %v324_v41 = vld [vmem:[%s2955_s30 + $0x180] sm:$0xff]  ;;  %v299_v17 = vld [vmem:[%s2955_s30 + $0xb8] sm:$0xff] }
  0x7a   : > { %2330 = vmatpush3.bf16.msra.mxu1 %v2565_v43  ;;  %1219 = vmatprep.mubr.bf16.mxu0 %v2001_v46  ;;  %v2589_v43 = vld [vmem:[#allocation5 + $0x188] sm:$0xff]   ;;  %v2590_v46 = vld [vmem:[#allocation5 + $0x140] sm:$0xff]   ;;  %v2040_v58 = vcombine.low %v324_v41, %v328_v42  ;;  %v2014_v27 = vcombine.low %v295_v16, %v299_v17 }
  0x7b   : > { %1316 = vmatprep.mubr.bf16.mxu1 %v2003_v49  ;;  %2267 = vmatprep.subr.bf16.mxu0 %v2566_v50  ;;  %v2034_v49 = vcombine.low %v317_v29, %v321_v30  ;;  %v2041_v50 = vcombine.high %v324_v41, %v328_v42  ;;  %v310_v30 = vld [vmem:[%s2955_s30 + $0x110] sm:$0xff]  ;;  %v323_v41 = vld [vmem:[%s2955_s30 + $0x178] sm:$0xff] }
  0x7c   : > { %2331 = vmatprep.subr.bf16.mxu1 %v2568_v54  ;;  %v332_v54 = vld [vmem:[%s2955_s30 + $0x1c0] sm:$0xff] }
  0x7d   : > { %2268 = vmatpush3.bf16.msra.mxu0 %v2567_v52  ;;  %v2043_v52 = vcombine.high %v325_v44, %v329_v45 }
  0x7e   : > { %2332 = vmatpush3.bf16.msra.mxu1 %v2569_v55  ;;  %2269 = vmatprep.subr.bf16.mxu0 %v2570_v62  ;;  %v336_v55 = vld [vmem:[%s2955_s30 + $0x1e0] sm:$0xff]  ;;  %v278_v62 = vld [vmem:[%s2955_s30 + $0x10] sm:$0xff] }
  0x7f   : > { %2333 = vmatprep.subr.bf16.mxu1 %v2572_v0  ;;  %v279_v0 = vld [vmem:[%s2955_s30 + $0x18] sm:$0xff] }
  0x80   : > { %1220 = vmatmul.mubr.bf16.gmra.mxu0 %v2000_v51  ;;  %v2592_v51 = vld [vmem:[#allocation5 + $0x1c0] sm:$0xff]  }
  0x81   : > { %1317 = vmatmul.mubr.bf16.gmra.mxu1 %v2002_v53  ;;  %1227 = vmatprep.mubr.bf16.mxu0 %v2009_v60  ;;  %v2593_v53 = vld [vmem:[#allocation5 + $0x180] sm:$0xff]   ;;  %v2049_v60 = vcombine.high %v332_v54, %v336_v55 }
  0x82   : > { %1324 = vmatprep.mubr.bf16.mxu1 %v2011_v61  ;;  %2270 = vmatpush3.bf16.msra.mxu0 %v2571_v63  ;;  %v2051_v61 = vcombine.high %v333_v56, %v337_v57  ;;  %v282_v63 = vld [vmem:[%s2955_s30 + $0x30] sm:$0xff]  ;;  %v335_v56 = vld [vmem:[%s2955_s30 + $0x1d8] sm:$0xff] }
  0x83   : > { %2334 = vmatpush3.bf16.msra.mxu1 %v2573_v1  ;;  %2271 = vmatprep.subr.bf16.mxu0 %v2574_v10  ;;  %v283_v1 = vld [vmem:[%s2955_s30 + $0x38] sm:$0xff]  ;;  %v1997_v4 = vcombine.high %v278_v62, %v282_v63  ;;  %v1996_v10 = vcombine.low %v278_v62, %v282_v63 }
  0x84   : > { %2335 = vmatprep.subr.bf16.mxu1 %v2576_v12  ;;  %v1999_v5 = vcombine.high %v279_v0, %v283_v1  ;;  %v339_v57 = vld [vmem:[%s2955_s30 + $0x1f8] sm:$0xff] }
  0x85   : > { %v2054_v63 = vcombine.low %v335_v56, %v339_v57 }
  0x86   : > { %2272 = vmatpush3.bf16.msra.mxu0 %v2575_v11  ;;  %v1998_v11 = vcombine.low %v279_v0, %v283_v1  ;;  %v2594_v0 = vld [vmem:[#allocation7 + $0x38] sm:$0xff]   ;;  %v2595_v1 = vld [vmem:[#allocation7 + $0x30] sm:$0xff]  }
  0x87   : > { %2336 = vmatpush3.bf16.msra.mxu1 %v2577_v13  ;;  %2273 = vmatprep.subr.bf16.mxu0 %v2578_v18 }
  0x88   : > { %1228 = vmatmul.mubr.bf16.gmra.mxu0 %v2008_v2  ;;  %2337 = vmatprep.subr.bf16.mxu1 %v2580_v23  ;;  %v2048_v2 = vcombine.low %v332_v54, %v336_v55  ;;  %v306_v23 = vld [vmem:[%s2955_s30 + $0xf0] sm:$0xff] }
  0x89   : > { %1325 = vmatmul.mubr.bf16.gmra.mxu1 %v2010_v6  ;;  %1235 = vmatprep.mubr.bf16.mxu0 %v2017_v7  ;;  %v286_v6 = vld [vmem:[%s2955_s30 + $0x50] sm:$0xff] }
  0x8a   : > { %1332 = vmatprep.mubr.bf16.mxu1 %v2019_v9  ;;  %2274 = vmatpush3.bf16.msra.mxu0 %v2579_v20  ;;  %v290_v7 = vld [vmem:[%s2955_s30 + $0x70] sm:$0xff]  ;;  %v291_v9 = vld [vmem:[%s2955_s30 + $0x78] sm:$0xff]  ;;  %v2013_v20 = vcombine.high %v294_v14, %v298_v15 }
  0x8b   : > { %2338 = vmatpush3.bf16.msra.mxu1 %v2581_v25  ;;  %2275 = vmatprep.subr.bf16.mxu0 %v2582_v28  ;;  %v2005_v12 = vcombine.high %v286_v6, %v290_v7  ;;  %v2007_v13 = vcombine.high %v287_v8, %v291_v9  ;;  %v2004_v18 = vcombine.low %v286_v6, %v290_v7  ;;  %v307_v25 = vld [vmem:[%s2955_s30 + $0xf8] sm:$0xff]  ;;  %v334_v54 = vld [vmem:[%s2955_s30 + $0x1d0] sm:$0xff]  ;;  %v2600_v6 = vld [vmem:[#allocation7 + $0x8] sm:$0xff]  }
  0x8c   : > { %2339 = vmatprep.subr.bf16.mxu1 %v2584_v32  ;;  %v311_v32 = vld [vmem:[%s2955_s30 + $0x118] sm:$0xff]  ;;  %v338_v55 = vld [vmem:[%s2955_s30 + $0x1f0] sm:$0xff]  ;;  %v2601_v7 = vld [vmem:[#allocation7] sm:$0xff]  }
  0x8d   : > { %v2052_v62 = vcombine.low %v334_v54, %v338_v55 }
  0x8e   : > { %2276 = vmatpush3.bf16.msra.mxu0 %v2583_v31  ;;  %v314_v31 = vld [vmem:[%s2955_s30 + $0x130] sm:$0xff] }
  0x8f   : > { %2340 = vmatpush3.bf16.msra.mxu1 %v2585_v33  ;;  %2277 = vmatprep.subr.bf16.mxu0 %v2586_v38  ;;  %v315_v33 = vld [vmem:[%s2955_s30 + $0x138] sm:$0xff]  ;;  %v318_v38 = vld [vmem:[%s2955_s30 + $0x150] sm:$0xff]  ;;  %v2028_v42 = vcombine.low %v310_v30, %v314_v31 }
  0x90   : > { %1236 = vmatmul.mubr.bf16.gmra.mxu0 %v2016_v19  ;;  %2341 = vmatprep.subr.bf16.mxu1 %v2588_v40  ;;  %v2006_v19 = vcombine.low %v287_v8, %v291_v9  ;;  %v319_v40 = vld [vmem:[%s2955_s30 + $0x158] sm:$0xff] }
  0x91   : > { %1333 = vmatmul.mubr.bf16.gmra.mxu1 %v2018_v21  ;;  %1243 = vmatprep.mubr.bf16.mxu0 %v2025_v22  ;;  %v2015_v21 = vcombine.high %v295_v16, %v299_v17  ;;  %v302_v22 = vld [vmem:[%s2955_s30 + $0xd0] sm:$0xff]  ;;  %v2039_v45 = vcombine.high %v319_v40, %v323_v41 }
  0x92   : > { %1340 = vmatprep.mubr.bf16.mxu1 %v2027_v24  ;;  %2278 = vmatpush3.bf16.msra.mxu0 %v2587_v39  ;;  %v303_v24 = vld [vmem:[%s2955_s30 + $0xd8] sm:$0xff]  ;;  %v2021_v28 = vcombine.high %v302_v22, %v306_v23  ;;  %v322_v39 = vld [vmem:[%s2955_s30 + $0x170] sm:$0xff] }
  0x93   : > { %2342 = vmatpush3.bf16.msra.mxu1 %v2589_v43  ;;  %2279 = vmatprep.subr.bf16.mxu0 %v2590_v46  ;;  %v2023_v29 = vcombine.high %v303_v24, %v307_v25  ;;  %v2030_v43 = vcombine.low %v311_v32, %v315_v33  ;;  %v2037_v44 = vcombine.high %v318_v38, %v322_v39  ;;  %v326_v46 = vld [vmem:[%s2955_s30 + $0x190] sm:$0xff] }
  0x94   : > { %2343 = vmatprep.subr.bf16.mxu1 %v2592_v51  ;;  %v2038_v51 = vcombine.low %v319_v40, %v323_v41 }
  0x96   : > { %2280 = vmatpush3.bf16.msra.mxu0 %v2591_v48  ;;  %v327_v48 = vld [vmem:[%s2955_s30 + $0x198] sm:$0xff] }
  0x97   : > { %2344 = vmatpush3.bf16.msra.mxu1 %v2593_v53  ;;  %2409 = vmatprep.subr.bf16.mxu0 %v2594_v0 }
  0x98   : > { %1244 = vmatmul.mubr.bf16.gmra.mxu0 %v2024_v34  ;;  %v2020_v34 = vcombine.low %v302_v22, %v306_v23  ;;  %2441 = vmatprep.subr.bf16.mxu1 %v2594_v0 }
  0x99   : > { %1341 = vmatmul.mubr.bf16.gmra.mxu1 %v2026_v35  ;;  %1251 = vmatprep.mubr.bf16.mxu0 %v2033_v36  ;;  %v2022_v35 = vcombine.low %v303_v24, %v307_v25  ;;  %v2029_v36 = vcombine.high %v310_v30, %v314_v31 }
  0x9a   : > { %1348 = vmatprep.mubr.bf16.mxu1 %v2035_v37  ;;  %v2031_v37 = vcombine.high %v311_v32, %v315_v33 }
  0xa0   : > { %1252 = vmatmul.mubr.bf16.gmra.mxu0 %v2032_v47  ;;  %v330_v47 = vld [vmem:[%s2955_s30 + $0x1b0] sm:$0xff] }
  0xa1   : > { %1349 = vmatmul.mubr.bf16.gmra.mxu1 %v2034_v49  ;;  %1259 = vmatprep.mubr.bf16.mxu0 %v2041_v50  ;;  %v331_v49 = vld [vmem:[%s2955_s30 + $0x1b8] sm:$0xff]  ;;  %v2036_v50 = vcombine.low %v318_v38, %v322_v39  ;;  %s2720_s30 = scalar_lea.vmem %s2719_s29, 4096 }
  0xa2   : > { %1356 = vmatprep.mubr.bf16.mxu1 %v2043_v52  ;;  %v2045_v52 = vcombine.high %v326_v46, %v330_v47  ;;  %v2047_v53 = vcombine.high %v327_v48, %v331_v49  ;;  %p2722_p12 = scmp.lt.s32.totalorder %s2720_s30, %s2714_s14 }
  0xa4   : > { %p2723_p7 = por %p2722_p12, %p2721_p6 }
  0xa6   : > { %p2724_p9 = pnand %p2723_p7, %p2717_p2 }
  0xa8   : > { %1260 = vmatmul.mubr.bf16.gmra.mxu0 %v2040_v58  ;;  %v2044_v58 = vcombine.low %v326_v46, %v330_v47 }
  0xa9   : > { %1357 = vmatmul.mubr.bf16.gmra.mxu1 %v2042_v59  ;;  %1267 = vmatprep.mubr.bf16.mxu0 %v2049_v60  ;;  %v2046_v59 = vcombine.low %v327_v48, %v331_v49  ;;  %v2053_v60 = vcombine.high %v334_v54, %v338_v55 }
  0xaa   : > { %1364 = vmatprep.mubr.bf16.mxu1 %v2051_v61  ;;  %v2055_v61 = vcombine.high %v335_v56, %v339_v57 }
  0xb0   : > { %1268 = vmatmul.mubr.bf16.gmra.mxu0 %v2048_v2  ;;  %v2596_v2 = vld [vmem:[#allocation7 + $0x28] sm:$0xff]  }
  0xb1   : > { %1365 = vmatmul.mubr.bf16.gmra.mxu1 %v2050_v3  ;;  %1405 = vmatprep.mubr.bf16.mxu0 %v1997_v4  ;;  %v2597_v3 = vld [vmem:[#allocation7 + $0x20] sm:$0xff]   ;;  %v2598_v4 = vld [vmem:[#allocation7 + $0x18] sm:$0xff]  }
  0xb2   : > { %1502 = vmatprep.mubr.bf16.mxu1 %v1999_v5  ;;  %v2599_v5 = vld [vmem:[#allocation7 + $0x10] sm:$0xff]  }
  0xb8   : > { %1406 = vmatmul.mubr.bf16.vlgmr.msra.gmra.mxu0 %v1996_v10  ;;  %v3032_v10 = vld [vmem:[%s3324_s2] ss:$0 sm:$0xff] }
  0xb9   : > { %1503 = vmatmul.mubr.bf16.vlgmr.msra.gmra.mxu1 %v1998_v11  ;;  %1413 = vmatprep.mubr.bf16.mxu0 %v2005_v12 }
  0xba   : > { %1510 = vmatprep.mubr.bf16.mxu1 %v2007_v13  ;;  %2410 = vmatpush3.bf16.msra.mxu0 %v2594_v0 }
  0xbb   : > { %2449 = vmatpush3.bf16.msra.mxu1 %v2594_v0  ;;  %2411 = vmatprep.subr.bf16.mxu0 %v2595_v1 }
  0xbc   : > { %2442 = vmatprep.subr.bf16.mxu1 %v2595_v1 }
  0xbe   : > { %2412 = vmatpush3.bf16.msra.mxu0 %v2595_v1 }
  0xbf   : > { %2450 = vmatpush3.bf16.msra.mxu1 %v2595_v1  ;;  %2413 = vmatprep.subr.bf16.mxu0 %v2596_v2 }
  0xc0   : > { %1414 = vmatmul.mubr.bf16.gmra.mxu0 %v2004_v18  ;;  %2443 = vmatprep.subr.bf16.mxu1 %v2596_v2 }
  0xc1   : > { %1511 = vmatmul.mubr.bf16.gmra.mxu1 %v2006_v19  ;;  %1421 = vmatprep.mubr.bf16.mxu0 %v2013_v20 }
  0xc2   : > { %1518 = vmatprep.mubr.bf16.mxu1 %v2015_v21  ;;  %2414 = vmatpush3.bf16.msra.mxu0 %v2596_v2 }
  0xc3   : > { %2451 = vmatpush3.bf16.msra.mxu1 %v2596_v2  ;;  %2415 = vmatprep.subr.bf16.mxu0 %v2597_v3 }
  0xc4   : > { %2444 = vmatprep.subr.bf16.mxu1 %v2597_v3 }
  0xc6   : > { %2416 = vmatpush3.bf16.msra.mxu0 %v2597_v3 }
  0xc7   : > { %2452 = vmatpush3.bf16.msra.mxu1 %v2597_v3  ;;  %2417 = vmatprep.subr.bf16.mxu0 %v2598_v4 }
  0xc8   : > { %1422 = vmatmul.mubr.bf16.gmra.mxu0 %v2012_v26  ;;  %2445 = vmatprep.subr.bf16.mxu1 %v2598_v4 }
  0xc9   : > { %1519 = vmatmul.mubr.bf16.gmra.mxu1 %v2014_v27  ;;  %1429 = vmatprep.mubr.bf16.mxu0 %v2021_v28 }
  0xca   : > { %1526 = vmatprep.mubr.bf16.mxu1 %v2023_v29  ;;  %2418 = vmatpush3.bf16.msra.mxu0 %v2598_v4 }
  0xcb   : > { %2453 = vmatpush3.bf16.msra.mxu1 %v2598_v4  ;;  %2419 = vmatprep.subr.bf16.mxu0 %v2599_v5 }
  0xcc   : > { %2446 = vmatprep.subr.bf16.mxu1 %v2599_v5 }
  0xce   : > { %2420 = vmatpush3.bf16.msra.mxu0 %v2599_v5 }
  0xcf   : > { %2454 = vmatpush3.bf16.msra.mxu1 %v2599_v5  ;;  %2421 = vmatprep.subr.bf16.mxu0 %v2600_v6 }
  0xd0   : > { %1430 = vmatmul.mubr.bf16.gmra.mxu0 %v2020_v34  ;;  %2447 = vmatprep.subr.bf16.mxu1 %v2600_v6 }
  0xd1   : > { %1527 = vmatmul.mubr.bf16.gmra.mxu1 %v2022_v35  ;;  %1437 = vmatprep.mubr.bf16.mxu0 %v2029_v36 }
  0xd2   : > { %1534 = vmatprep.mubr.bf16.mxu1 %v2031_v37  ;;  %2422 = vmatpush3.bf16.msra.mxu0 %v2600_v6 }
  0xd3   : > { %2455 = vmatpush3.bf16.msra.mxu1 %v2600_v6  ;;  %2423 = vmatprep.subr.bf16.mxu0 %v2601_v7 }
  0xd4   : > { %2448 = vmatprep.subr.bf16.mxu1 %v2601_v7 }
  0xd6   : > { %2424 = vmatpush3.bf16.msra.mxu0 %v2601_v7 }
  0xd7   : > { %2456 = vmatpush3.bf16.msra.mxu1 %v2601_v7 }
  0xd8   : > { %1438 = vmatmul.mubr.bf16.gmra.mxu0 %v2028_v42 }
  0xd9   : > { %1535 = vmatmul.mubr.bf16.gmra.mxu1 %v2030_v43  ;;  %1445 = vmatprep.mubr.bf16.mxu0 %v2037_v44 }
  0xda   : > { %1542 = vmatprep.mubr.bf16.mxu1 %v2039_v45 }
  0xe0   : > { %1446 = vmatmul.mubr.bf16.gmra.mxu0 %v2036_v50 }
  0xe1   : > { %1543 = vmatmul.mubr.bf16.gmra.mxu1 %v2038_v51  ;;  %1453 = vmatprep.mubr.bf16.mxu0 %v2045_v52 }
  0xe2   : > { %1550 = vmatprep.mubr.bf16.mxu1 %v2047_v53 }
  0xe8   : > { %1454 = vmatmul.mubr.bf16.gmra.mxu0 %v2044_v58 }
  0xe9   : > { %1551 = vmatmul.mubr.bf16.gmra.mxu1 %v2046_v59  ;;  %1461 = vmatprep.mubr.bf16.mxu0 %v2053_v60 }
  0xea   : > { %1558 = vmatprep.mubr.bf16.mxu1 %v2055_v61 }
  0xf0   : > { %1462 = vmatmul.mubr.bf16.gmra.mxu0 %v2052_v62 }
  0xf1   : > { %1559 = vmatmul.mubr.bf16.gmra.mxu1 %v2054_v63 }
 0x138   : > { %v2153_v8 = vpop.f32.mrf.mxu0 }
 0x139   : > { %v2217_v9 = vpop.f32.mrf.mxu1 }
 0x13a   : > { %v2154_v11 = vpop.f32.mrf.mxu0 }
 0x13b   : > { %v2155_v12 = vadd.f32 %v2154_v11, %v2153_v8  ;;  %v2218_v13 = vpop.f32.mrf.mxu1 }
 0x13c   : > { %v2219_v14 = vadd.f32 %v2218_v13, %v2217_v9  ;;  %v3034_v15 = vpop.f32.mrf.mxu0 }
 0x13d   : > { %v1214_v16 = vadd.f32 %v2155_v12, %v3032_v10  ;;  %v3037_v17 = vpop.f32.mrf.mxu1 }
 0x13e   : > { %v3039_v18 = vpop.f32.mrf.mxu0 }
 0x13f   : > { %v3041_v19 = vadd.f32 %v2219_v14, %v1214_v16  ;;  %v3043_v20 = vpop.f32.mrf.mxu1 }
 0x140   : > { %v2159_v21 = vpop.f32.mrf.mxu0 }
 0x141   : > { %v2223_v22 = vpop.f32.mrf.mxu1 }
 0x142   : > { %v2160_v23 = vpop.f32.mrf.mxu0 }
 0x143   : > { %v2161_v24 = vadd.f32 %v2160_v23, %v2159_v21  ;;  %v2224_v25 = vpop.f32.mrf.mxu1 }
 0x144   : > { %v2225_v26 = vadd.f32 %v2224_v25, %v2223_v22  ;;  %v3045_v27 = vpop.f32.mrf.mxu0 }
 0x145   : > { %v1222_v28 = vadd.f32 %v2161_v24, %v3032_v10  ;;  %v3048_v29 = vpop.f32.mrf.mxu1 }
 0x146   : > { %v3050_v30 = vpop.f32.mrf.mxu0 }
 0x147   : > { %v3052_v31 = vadd.f32 %v2225_v26, %v1222_v28  ;;  %v3054_v32 = vpop.f32.mrf.mxu1 }
 0x148   : > { %v2165_v33 = vpop.f32.mrf.mxu0 }
 0x149   : > { %v2229_v34 = vpop.f32.mrf.mxu1 }
 0x14a   : > { %v2166_v35 = vpop.f32.mrf.mxu0 }
 0x14b   : > { %v2167_v36 = vadd.f32 %v2166_v35, %v2165_v33  ;;  %v2230_v37 = vpop.f32.mrf.mxu1 }
 0x14c   : > { %v2231_v38 = vadd.f32 %v2230_v37, %v2229_v34  ;;  %v3056_v39 = vpop.f32.mrf.mxu0 }
 0x14d   : > { %v1230_v40 = vadd.f32 %v2167_v36, %v3032_v10  ;;  %v3059_v41 = vpop.f32.mrf.mxu1 }
 0x14e   : > { %v3061_v42 = vpop.f32.mrf.mxu0 }
 0x14f   : > { %v3063_v43 = vadd.f32 %v2231_v38, %v1230_v40  ;;  %v3065_v44 = vpop.f32.mrf.mxu1 }
 0x150   : > { %v2171_v45 = vpop.f32.mrf.mxu0 }
 0x151   : > { %v2235_v46 = vpop.f32.mrf.mxu1 }
 0x152   : > { %v2172_v47 = vpop.f32.mrf.mxu0 }
 0x153   : > { %v2173_v48 = vadd.f32 %v2172_v47, %v2171_v45  ;;  %v2236_v49 = vpop.f32.mrf.mxu1 }
 0x154   : > { %v2237_v50 = vadd.f32 %v2236_v49, %v2235_v46  ;;  %v3067_v51 = vpop.f32.mrf.mxu0 }
 0x155   : > { %v1238_v52 = vadd.f32 %v2173_v48, %v3032_v10  ;;  %v3070_v53 = vpop.f32.mrf.mxu1 }
 0x156   : > { %v3072_v54 = vpop.f32.mrf.mxu0 }
 0x157   : > { %v3074_v55 = vadd.f32 %v2237_v50, %v1238_v52  ;;  %v3076_v56 = vpop.f32.mrf.mxu1 }
 0x158   : > { %v2177_v57 = vpop.f32.mrf.mxu0 }
 0x159   : > { %v2241_v58 = vpop.f32.mrf.mxu1 }
 0x15a   : > { %v2178_v59 = vpop.f32.mrf.mxu0 }
 0x15b   : > { %v2179_v60 = vadd.f32 %v2178_v59, %v2177_v57  ;;  %v2242_v61 = vpop.f32.mrf.mxu1 }
 0x15c   : > { %v2243_v62 = vadd.f32 %v2242_v61, %v2241_v58  ;;  %v3078_v63 = vpop.f32.mrf.mxu0 }
 0x15d   : > { %v1246_v0 = vadd.f32 %v2179_v60, %v3032_v10  ;;  %v3081_v1 = vpop.f32.mrf.mxu1  ;;  %v2158_v60 = vadd.f32 %v3039_v18, %v3034_v15  ;;  %v2164_v18 = vadd.f32 %v3050_v30, %v3045_v27 }
 0x15e   : > { %v3083_v2 = vpop.f32.mrf.mxu0 }
 0x15f   : > { %v3085_v3 = vadd.f32 %v2243_v62, %v1246_v0  ;;  %v3087_v4 = vpop.f32.mrf.mxu1 }
 0x160   : > { %v2183_v5 = vpop.f32.mrf.mxu0 }
 0x161   : > { %v2247_v6 = vpop.f32.mrf.mxu1 }
 0x162   : > { %v2184_v7 = vpop.f32.mrf.mxu0 }
 0x163   : > { %v2185_v8 = vadd.f32 %v2184_v7, %v2183_v5  ;;  %v2248_v9 = vpop.f32.mrf.mxu1  ;;  %v1217_v7 = vadd.f32 %v2158_v60, %v3032_v10  ;;  %v2228_v60 = vadd.f32 %v3054_v32, %v3048_v29 }
 0x164   : > { %v2249_v11 = vadd.f32 %v2248_v9, %v2247_v6  ;;  %v3089_v12 = vpop.f32.mrf.mxu0 }
 0x165   : > { %v1254_v13 = vadd.f32 %v2185_v8, %v3032_v10  ;;  %v3092_v14 = vpop.f32.mrf.mxu1 }
 0x166   : > { %v3094_v16 = vpop.f32.mrf.mxu0 }
 0x167   : > { %v3096_v21 = vadd.f32 %v2249_v11, %v1254_v13  ;;  %v3098_v22 = vpop.f32.mrf.mxu1  ;;  %v2222_v13 = vadd.f32 %v3043_v20, %v3037_v17 }
 0x168   : > { %v2189_v23 = vpop.f32.mrf.mxu0 }
 0x169   : > { %v2253_v24 = vpop.f32.mrf.mxu1  ;;  %v1314_v15 = vadd.f32 %v2222_v13, %v1217_v7 }
 0x16a   : > { %v2190_v25 = vpop.f32.mrf.mxu0 }
 0x16b   : > { %v2191_v26 = vadd.f32 %v2190_v25, %v2189_v23  ;;  %v2254_v28 = vpop.f32.mrf.mxu1 }
 0x16c   : > { %v2255_v33 = vadd.f32 %v2254_v28, %v2253_v24  ;;  %v3100_v34 = vpop.f32.mrf.mxu0 }
 0x16d   : > { %v1262_v35 = vadd.f32 %v2191_v26, %v3032_v10  ;;  %v3103_v36 = vpop.f32.mrf.mxu1 }
 0x16e   : > { %v3105_v37 = vpop.f32.mrf.mxu0 }
 0x16f   : > { %v3107_v38 = vadd.f32 %v2255_v33, %v1262_v35  ;;  %v3109_v40 = vpop.f32.mrf.mxu1 }
 0x170   : > { %v2195_v45 = vpop.f32.mrf.mxu0 }
 0x171   : > { %v2259_v46 = vpop.f32.mrf.mxu1 }
 0x172   : > { %v2196_v47 = vpop.f32.mrf.mxu0 }
 0x173   : > { %v2197_v48 = vadd.f32 %v2196_v47, %v2195_v45  ;;  %v2260_v49 = vpop.f32.mrf.mxu1 }
 0x174   : > { %v2261_v50 = vadd.f32 %v2260_v49, %v2259_v46  ;;  %v3111_v52 = vpop.f32.mrf.mxu0 }
 0x175   : > { %v1270_v57 = vadd.f32 %v2197_v48, %v3032_v10  ;;  %v3114_v58 = vpop.f32.mrf.mxu1 }
 0x176   : > { %v3116_v59 = vpop.f32.mrf.mxu0 }
 0x177   : > { %v3120_v61 = vadd.f32 %v2261_v50, %v1270_v57  ;;  %v3122_v62 = vpop.f32.mrf.mxu1  ;;  %v1225_v50 = vadd.f32 %v2164_v18, %v3032_v10 }
 0x178   : > { %v2281_v0 = vpop.f32.mrf.mxu0 }
 0x179   : > { %v2345_v5 = vpop.f32.mrf.mxu1 }
 0x17a   : > { %v2282_v6 = vpop.f32.mrf.mxu0 }
 0x17b   : > { %v2283_v8 = vadd.f32 %v2282_v6, %v2281_v0  ;;  %v2346_v9 = vpop.f32.mrf.mxu1  ;;  %v2170_v6 = vadd.f32 %v3061_v42, %v3056_v39  ;;  %v2234_v39 = vadd.f32 %v3065_v44, %v3059_v41 }
 0x17c   : > { %v2284_v11 = vpop.f32.mrf.mxu0  ;;  %v2347_v26 = vadd.f32 %v2346_v9, %v2345_v5 }
 0x17d   : > { %v1408_v23 = vadd.f32 %v2283_v8, %v3041_v19  ;;  %v2348_v24 = vpop.f32.mrf.mxu1  ;;  %v1322_v8 = vadd.f32 %v2228_v60, %v1225_v50  ;;  %v1233_v29 = vadd.f32 %v2170_v6, %v3032_v10  ;;  %v2176_v50 = vadd.f32 %v3072_v54, %v3067_v51 }
 0x17e   : > { %v2285_v25 = vpop.f32.mrf.mxu0  ;;  %v2240_v51 = vadd.f32 %v3076_v56, %v3070_v53 }
 0x17f   : > { %v2286_v28 = vadd.f32 %v2285_v25, %v2284_v11  ;;  %v2349_v33 = vpop.f32.mrf.mxu1  ;;  %v1505_v45 = vadd.f32 %v2347_v26, %v1408_v23 }
 0x180   : > { %v2287_v35 = vpop.f32.mrf.mxu0  ;;  %v2350_v47 = vadd.f32 %v2349_v33, %v2348_v24 }
 0x181   : > { %v1411_v46 = vadd.f32 %v2286_v28, %v1314_v15  ;;  %v2351_v48 = vpop.f32.mrf.mxu1  ;;  %v1567_v0 = vmax.f32 %v1505_v45, 0.0 }
 0x182   : > { %v2288_v49 = vpop.f32.mrf.mxu0 }
 0x183   : > { %v1508_v17 = vadd.f32 %v2350_v47, %v1411_v46  ;;  %v2289_v20 = vadd.f32 %v2288_v49, %v2287_v35  ;;  %v2352_v19 = vpop.f32.mrf.mxu1 }
 0x184   : > { %v2290_v57 = vpop.f32.mrf.mxu0  ;;  %v2353_v9 = vadd.f32 %v2352_v19, %v2351_v48  ;;  %v1330_v48 = vadd.f32 %v2234_v39, %v1233_v29 }
 0x185   : > { %v1568_v27 = vmax.f32 %v1508_v17, 0.0  ;;  %v1416_v30 = vadd.f32 %v2289_v20, %v3052_v31  ;;  %v2354_v5 = vpop.f32.mrf.mxu1 }
 0x186   : > { %v2291_v7 = vpop.f32.mrf.mxu0 }
 0x187   : > { %v2292_v11 = vadd.f32 %v2291_v7, %v2290_v57  ;;  %v2355_v13 = vpop.f32.mrf.mxu1  ;;  %v1583_v23 = vpack.c.bf16 %v1568_v27, %v1567_v0  ;;  %v1513_v25 = vadd.f32 %v2353_v9, %v1416_v30 }
 0x188   : > { %v2293_v24 = vpop.f32.mrf.mxu0  ;;  %v2356_v18 = vadd.f32 %v2355_v13, %v2354_v5  ;;  %v1241_v5 = vadd.f32 %v2176_v50, %v3032_v10 }
 0x189   : > { %v1419_v15 = vadd.f32 %v2292_v11, %v1322_v8  ;;  %v2357_v26 = vpop.f32.mrf.mxu1  ;;  %2425 = vmatprep.mubr.bf16.mxu0 %v1583_v23  ;;  %v1569_v35 = vmax.f32 %v1513_v25, 0.0  ;;  %v2182_v23 = vadd.f32 %v3083_v2, %v3078_v63  ;;  %v2246_v63 = vadd.f32 %v3087_v4, %v3081_v1 }
 0x18a   : > { %v2294_v32 = vpop.f32.mrf.mxu0  ;;  %v1338_v25 = vadd.f32 %v2240_v51, %v1241_v5 }
 0x18b   : > { %v1516_v31 = vadd.f32 %v2356_v18, %v1419_v15  ;;  %v2295_v28 = vadd.f32 %v2294_v32, %v2293_v24  ;;  %v2358_v33 = vpop.f32.mrf.mxu1  ;;  %v1249_v53 = vadd.f32 %v2182_v23, %v3032_v10 }
 0x18c   : > { %v2296_v42 = vpop.f32.mrf.mxu0  ;;  %v2359_v20 = vadd.f32 %v2358_v33, %v2357_v26 }
 0x18d   : > { %v1570_v45 = vmax.f32 %v1516_v31, 0.0  ;;  %v1424_v46 = vadd.f32 %v2295_v28, %v3063_v43  ;;  %v2360_v47 = vpop.f32.mrf.mxu1 }
 0x18e   : > { %v2297_v49 = vpop.f32.mrf.mxu0 }
 0x18f   : > { %v1584_v17 = vpack.c.bf16 %v1570_v45, %v1569_v35  ;;  %v2298_v19 = vadd.f32 %v2297_v49, %v2296_v42  ;;  %v2361_v57 = vpop.f32.mrf.mxu1  ;;  %v1521_v0 = vadd.f32 %v2359_v20, %v1424_v46  ;;  %v1346_v49 = vadd.f32 %v2246_v63, %v1249_v53 }
 0x190   : > { %v2299_v60 = vpop.f32.mrf.mxu0  ;;  %v2362_v30 = vadd.f32 %v2361_v57, %v2360_v47 }
 0x191   : > { %v1427_v27 = vadd.f32 %v2298_v19, %v1330_v48  ;;  %v2363_v41 = vpop.f32.mrf.mxu1  ;;  %2426 = vmatmul.mubr.bf16.vlgmr.msra.gmra.mxu0 %v1584_v17  ;;  %v1571_v54 = vmax.f32 %v1521_v0, 0.0  ;;  %v2188_v17 = vadd.f32 %v3094_v16, %v3089_v12  ;;  %v2252_v12 = vadd.f32 %v3098_v22, %v3092_v14 }
 0x192   : > { %v2300_v44 = vpop.f32.mrf.mxu0 }
 0x193   : > { %v1524_v43 = vadd.f32 %v2362_v30, %v1427_v27  ;;  %v2301_v6 = vadd.f32 %v2300_v44, %v2299_v60  ;;  %v2364_v7 = vpop.f32.mrf.mxu1  ;;  %v1257_v44 = vadd.f32 %v2188_v17, %v3032_v10 }
 0x194   : > { %v2302_v8 = vpop.f32.mrf.mxu0  ;;  %v2365_v15 = vadd.f32 %v2364_v7, %v2363_v41 }
 0x195   : > { %v1572_v9 = vmax.f32 %v1524_v43, 0.0  ;;  %v1432_v11 = vadd.f32 %v2301_v6, %v3074_v55  ;;  %v2366_v13 = vpop.f32.mrf.mxu1 }
 0x196   : > { %v2303_v24 = vpop.f32.mrf.mxu0 }
 0x197   : > { %v2304_v18 = vadd.f32 %v2303_v24, %v2302_v8  ;;  %v2367_v26 = vpop.f32.mrf.mxu1  ;;  %v1585_v29 = vpack.c.bf16 %v1572_v9, %v1571_v54  ;;  %v1529_v31 = vadd.f32 %v2365_v15, %v1432_v11  ;;  %v2194_v54 = vadd.f32 %v3105_v37, %v3100_v34 }
 0x198   : > { %v2305_v32 = vpop.f32.mrf.mxu0  ;;  %v2368_v33 = vadd.f32 %v2367_v26, %v2366_v13  ;;  %v1354_v11 = vadd.f32 %v2252_v12, %v1257_v44  ;;  %v2258_v34 = vadd.f32 %v3109_v40, %v3103_v36 }
 0x199   : > { %v1435_v28 = vadd.f32 %v2304_v18, %v1338_v25  ;;  %v2369_v39 = vpop.f32.mrf.mxu1  ;;  %2429 = vmatprep.mubr.bf16.mxu0 %v1585_v29  ;;  %v1573_v45 = vmax.f32 %v1529_v31, 0.0  ;;  %v1265_v14 = vadd.f32 %v2194_v54, %v3032_v10 }
 0x19a   : > { %v2306_v56 = vpop.f32.mrf.mxu0 }
 0x19b   : > { %v1532_v55 = vadd.f32 %v2368_v33, %v1435_v28  ;;  %v2307_v42 = vadd.f32 %v2306_v56, %v2305_v32  ;;  %v2370_v35 = vpop.f32.mrf.mxu1 }
 0x19c   : > { %v2308_v2 = vpop.f32.mrf.mxu0  ;;  %v2371_v20 = vadd.f32 %v2370_v35, %v2369_v39  ;;  %v2200_v35 = vadd.f32 %v3116_v59, %v3111_v52  ;;  %v2264_v52 = vadd.f32 %v3122_v62, %v3114_v58  ;;  %v2120_v58 = vld [vmem:[%s3326_s4] ss:$0 sm:$0xff] }
 0x19d   : > { %v1574_v46 = vmax.f32 %v1532_v55, 0.0  ;;  %v1440_v47 = vadd.f32 %v2307_v42, %v3085_v3  ;;  %v2372_v48 = vpop.f32.mrf.mxu1  ;;  %v1362_v55 = vadd.f32 %v2258_v34, %v1265_v14 }
 0x19e   : > { %v2309_v50 = vpop.f32.mrf.mxu0  ;;  %v1273_v17 = vadd.f32 %v2200_v35, %v3032_v10 }
 0x19f   : > { %v2310_v19 = vadd.f32 %v2309_v50, %v2308_v2  ;;  %v2373_v57 = vpop.f32.mrf.mxu1  ;;  %v1586_v60 = vpack.c.bf16 %v1574_v46, %v1573_v45  ;;  %v1537_v27 = vadd.f32 %v2371_v20, %v1440_v47 }
 0x1a0   : > { %v2311_v0 = vpop.f32.mrf.mxu0  ;;  %v2374_v41 = vadd.f32 %v2373_v57, %v2372_v48 }
 0x1a1   : > { %v1443_v30 = vadd.f32 %v2310_v19, %v1346_v49  ;;  %v2375_v1 = vpop.f32.mrf.mxu1  ;;  %2430 = vmatmul.mubr.bf16.gmra.mxu0 %v1586_v60  ;;  %v1575_v16 = vmax.f32 %v1537_v27, 0.0 }
 0x1a2   : > { %v2312_v4 = vpop.f32.mrf.mxu0 }
 0x1a3   : > { %v1540_v3 = vadd.f32 %v2374_v41, %v1443_v30  ;;  %v2313_v5 = vadd.f32 %v2312_v4, %v2311_v0  ;;  %v2376_v43 = vpop.f32.mrf.mxu1  ;;  %v1370_v41 = vadd.f32 %v2264_v52, %v1273_v17 }
 0x1a4   : > { %v2314_v6 = vpop.f32.mrf.mxu0  ;;  %v2377_v13 = vadd.f32 %v2376_v43, %v2375_v1 }
 0x1a5   : > { %v1576_v7 = vmax.f32 %v1540_v3, 0.0  ;;  %v1448_v8 = vadd.f32 %v2313_v5, %v3096_v21  ;;  %v2378_v51 = vpop.f32.mrf.mxu1 }
 0x1a6   : > { %v2315_v9 = vpop.f32.mrf.mxu0 }
 0x1a7   : > { %v2316_v23 = vadd.f32 %v2315_v9, %v2314_v6  ;;  %v2379_v24 = vpop.f32.mrf.mxu1  ;;  %v1587_v25 = vpack.c.bf16 %v1576_v7, %v1575_v16  ;;  %v1545_v18 = vadd.f32 %v2377_v13, %v1448_v8 }
 0x1a8   : > { %v2317_v15 = vpop.f32.mrf.mxu0  ;;  %v2380_v29 = vadd.f32 %v2379_v24, %v2378_v51 }
 0x1a9   : > { %v1451_v26 = vadd.f32 %v2316_v23, %v1354_v11  ;;  %v2381_v32 = vpop.f32.mrf.mxu1  ;;  %2433 = vmatprep.mubr.bf16.mxu1 %v1587_v25  ;;  %v1577_v33 = vmax.f32 %v1545_v18, 0.0 }
 0x1aa   : > { %v2318_v22 = vpop.f32.mrf.mxu0 }
 0x1ab   : > { %v1548_v21 = vadd.f32 %v2380_v29, %v1451_v26  ;;  %v2319_v31 = vadd.f32 %v2318_v22, %v2317_v15  ;;  %v2382_v28 = vpop.f32.mrf.mxu1 }
 0x1ac   : > { %v2320_v37 = vpop.f32.mrf.mxu0  ;;  %v2383_v2 = vadd.f32 %v2382_v28, %v2381_v32 }
 0x1ad   : > { %v1578_v39 = vmax.f32 %v1548_v21, 0.0  ;;  %v1456_v53 = vadd.f32 %v2319_v31, %v3107_v38  ;;  %v2384_v56 = vpop.f32.mrf.mxu1 }
 0x1ae   : > { %v2321_v42 = vpop.f32.mrf.mxu0 }
 0x1af   : > { %v1588_v63 = vpack.c.bf16 %v1578_v39, %v1577_v33  ;;  %v2322_v45 = vadd.f32 %v2321_v42, %v2320_v37  ;;  %v2385_v46 = vpop.f32.mrf.mxu1  ;;  %v1553_v48 = vadd.f32 %v2383_v2, %v1456_v53 }
 0x1b0   : > { %v2323_v47 = vpop.f32.mrf.mxu0  ;;  %v2386_v50 = vadd.f32 %v2385_v46, %v2384_v56 }
 0x1b1   : > { %v1459_v49 = vadd.f32 %v2322_v45, %v1362_v55  ;;  %v2387_v36 = vpop.f32.mrf.mxu1  ;;  %2434 = vmatmul.mubr.bf16.vlgmr.msra.gmra.mxu1 %v1588_v63  ;;  %v1579_v59 = vmax.f32 %v1553_v48, 0.0 }
 0x1b2   : > { %v2324_v40 = vpop.f32.mrf.mxu0 }
 0x1b3   : > { %v1556_v38 = vadd.f32 %v2386_v50, %v1459_v49  ;;  %v2325_v20 = vadd.f32 %v2324_v40, %v2323_v47  ;;  %v2388_v19 = vpop.f32.mrf.mxu1 }
 0x1b4   : > { %v2326_v57 = vpop.f32.mrf.mxu0  ;;  %v2389_v1 = vadd.f32 %v2388_v19, %v2387_v36 }
 0x1b5   : > { %v1580_v60 = vmax.f32 %v1556_v38, 0.0  ;;  %v1464_v0 = vadd.f32 %v2325_v20, %v3120_v61  ;;  %v2390_v27 = vpop.f32.mrf.mxu1 }
 0x1b6   : > { %v2327_v30 = vpop.f32.mrf.mxu0 }
 0x1b7   : > { %v2328_v4 = vadd.f32 %v2327_v30, %v2326_v57  ;;  %v2391_v44 = vpop.f32.mrf.mxu1  ;;  %v1589_v3 = vpack.c.bf16 %v1580_v60, %v1579_v59  ;;  %v1561_v5 = vadd.f32 %v2389_v1, %v1464_v0 }
 0x1b8   : > { %v2392_v43 = vadd.f32 %v2391_v44, %v2390_v27 }
 0x1b9   : > { %v1467_v10 = vadd.f32 %v2328_v4, %v1370_v41  ;;  %2437 = vmatprep.mubr.bf16.mxu1 %v1589_v3  ;;  %v1581_v12 = vmax.f32 %v1561_v5, 0.0 }
 0x1bb   : > { %v1564_v6 = vadd.f32 %v2392_v43, %v1467_v10 }
 0x1bd   : > { %v1582_v16 = vmax.f32 %v1564_v6, 0.0 }
 0x1bf   : > { %v1590_v7 = vpack.c.bf16 %v1582_v16, %v1581_v12 }
 0x1c1   : > { %2438 = vmatmul.mubr.bf16.gmra.mxu1 %v1590_v7 }
 0x251   : > { %v2427_v61 = vpop.f32.mrf.mxu0 }
 0x252   : > { %v3173_v62 = vadd.f32 %v2427_v61, %v2120_v58 }
 0x253   : > { %v1696_v8 = vpop.f32.mrf.mxu0 }
 0x254   : > { %v3175_v51 = vadd.f32 %v2120_v58, %v1696_v8  ;;  %v1761_v54 = vmul.f32 %v3173_v62, %v3173_v62 }
 0x255   : > { %v2428_v9 = vpop.f32.mrf.mxu0 }
 0x256   : > { %v3179_v11 = vadd.f32 %v2428_v9, %v2120_v58  ;;  %1779 = vadd.xlane.f32.xlu1 %v1761_v54  ;;  %v1759_v13 = vmul.f32 %v3175_v51, %v3175_v51 }
 0x257   : > { %v1699_v23 = vpop.f32.mrf.mxu0 }
 0x258   : > { %v3183_v24 = vadd.f32 %v2120_v58, %v1699_v23  ;;  %1775 = vadd.xlane.f32.xlu0 %v1759_v13  ;;  %v1762_v25 = vmul.f32 %v3179_v11, %v3179_v11 }
 0x25a   : > { %1781 = vadd.xlane.f32.xlu1 %v1762_v25  ;;  %v1760_v15 = vmul.f32 %v3183_v24, %v3183_v24 }
 0x25c   : > { %1777 = vadd.xlane.f32.xlu0 %v1760_v15 }
 0x261   : > { %v2431_v18 = vpop.f32.mrf.mxu0 }
 0x262   : > { %v3189_v26 = vadd.f32 %v2431_v18, %v2120_v58 }
 0x263   : > { %v1712_v29 = vpop.f32.mrf.mxu0 }
 0x264   : > { %v3191_v32 = vadd.f32 %v2120_v58, %v1712_v29  ;;  %v1765_v14 = vmul.f32 %v3189_v26, %v3189_v26 }
 0x265   : > { %v2432_v22 = vpop.f32.mrf.mxu0 }
 0x266   : > { %v3195_v21 = vadd.f32 %v2432_v22, %v2120_v58  ;;  %1787 = vadd.xlane.f32.xlu0 %v1765_v14  ;;  %v1763_v37 = vmul.f32 %v3191_v32, %v3191_v32 }
 0x267   : > { %v1715_v31 = vpop.f32.mrf.mxu0 }
 0x268   : > { %v3197_v28 = vadd.f32 %v2120_v58, %v1715_v31  ;;  %v1766_v34 = vmul.f32 %v3195_v21, %v3195_v21 }
 0x26a   : > { %1789 = vadd.xlane.f32.xlu1 %v1766_v34  ;;  %1783 = vadd.xlane.f32.xlu0 %v1763_v37  ;;  %v1764_v33 = vmul.f32 %v3197_v28, %v3197_v28 }
 0x26e   : > { %1785 = vadd.xlane.f32.xlu1 %v1764_v33 }
 0x271   : > { %v2435_v39 = vpop.f32.mrf.mxu1 }
 0x272   : > { %v3205_v53 = vadd.f32 %v2435_v39, %v2120_v58 }
 0x273   : > { %v1728_v56 = vpop.f32.mrf.mxu1 }
 0x274   : > { %v3207_v55 = vadd.f32 %v2120_v58, %v1728_v56  ;;  %v1769_v42 = vmul.f32 %v3205_v53, %v3205_v53 }
 0x275   : > { %v2436_v35 = vpop.f32.mrf.mxu1 }
 0x276   : > { %v3211_v63 = vadd.f32 %v2436_v35, %v2120_v58  ;;  %1795 = vadd.xlane.f32.xlu0 %v1769_v42  ;;  %v1767_v47 = vmul.f32 %v3207_v55, %v3207_v55 }
 0x277   : > { %v1731_v2 = vpop.f32.mrf.mxu1 }
 0x278   : > { %v3213_v45 = vadd.f32 %v2120_v58, %v1731_v2  ;;  %v1770_v46 = vmul.f32 %v3211_v63, %v3211_v63 }
 0x27a   : > { %1797 = vadd.xlane.f32.xlu1 %v1770_v46  ;;  %1791 = vadd.xlane.f32.xlu0 %v1767_v47  ;;  %v1768_v48 = vmul.f32 %v3213_v45, %v3213_v45 }
 0x27e   : > { %1793 = vadd.xlane.f32.xlu1 %v1768_v48 }
 0x281   : > { %v2439_v49 = vpop.f32.mrf.mxu1 }
 0x282   : > { %v3223_v17 = vadd.f32 %v2439_v49, %v2120_v58 }
 0x283   : > { %v1744_v50 = vpop.f32.mrf.mxu1 }
 0x284   : > { %v3221_v36 = vadd.f32 %v2120_v58, %v1744_v50  ;;  %v1773_v59 = vmul.f32 %v3223_v17, %v3223_v17 }
 0x285   : > { %v2440_v40 = vpop.f32.mrf.mxu1 }
 0x286   : > { %v1771_v38 = vmul.f32 %v3221_v36, %v3221_v36  ;;  %v3229_v57 = vadd.f32 %v2440_v40, %v2120_v58 }
 0x287   : > { %v1747_v20 = vpop.f32.mrf.mxu1 }
 0x288   : > { %v3227_v19 = vadd.f32 %v2120_v58, %v1747_v20  ;;  %1799 = vadd.xlane.f32.xlu0 %v1771_v38  ;;  %v1774_v60 = vmul.f32 %v3229_v57, %v3229_v57 }
 0x28a   : > { %v1772_v52 = vmul.f32 %v3227_v19, %v3227_v19 }
 0x28c   : > { %1801 = vadd.xlane.f32.xlu1 %v1772_v52  ;;  %1803 = vadd.xlane.f32.xlu0 %v1773_v59 }
 0x290   : > { %1805 = vadd.xlane.f32.xlu1 %v1774_v60 }
 0x2df   : > { %v1780_v0 = vpop.xlane.xlu1 %1779 }
 0x2e0   : > { %v1809_v27 = vmax.f32 %v1780_v0, 1e-12 }
 0x2e1   : > { %v1776_v30 = vpop.xlane.xlu0 %1775 }
 0x2e2   : > { %2602 = vrsqrt.f32 %v1809_v27  ;;  %v1807_v41 = vmax.f32 %v1776_v30, 1e-12 }
 0x2e3   : > { %v1782_v1 = vpop.xlane.xlu1 %1781 }
 0x2e4   : > { %2604 = vrsqrt.f32 %v1807_v41  ;;  %v1810_v4 = vmax.f32 %v1782_v1, 1e-12 }
 0x2e5   : > { %v1778_v44 = vpop.xlane.xlu0 %1777 }
 0x2e6   : > { %2606 = vrsqrt.f32 %v1810_v4  ;;  %v1808_v3 = vmax.f32 %v1778_v44, 1e-12 }
 0x2e8   : > { %2608 = vrsqrt.f32 %v1808_v3 }
 0x2ef   : > { %v2603_v5 = vpop.eup %2602  ;;  %v1788_v10 = vpop.xlane.xlu0 %1787 }
 0x2f0   : > { %v1841_v43 = vmul.f32 %v2603_v5, %v3173_v62  ;;  %v1813_v6 = vmax.f32 %v1788_v10, 1e-12 }
 0x2f1   : > { %v2605_v12 = vpop.eup %2604 }
 0x2f2   : > { %1857 = vst [vmem:[%s3239_s12 + $0x10] sm:$0xff] %v1841_v43  ;;  %v1839_v16 = vmul.f32 %v2605_v12, %v3175_v51  ;;  %2610 = vrsqrt.f32 %v1813_v6 }
 0x2f3   : > { %v2607_v7 = vpop.eup %2606  ;;  %v1790_v58 = vpop.xlane.xlu1 %1789 }
 0x2f4   : > { %v1784_v61 = vpop.xlane.xlu0 %1783  ;;  %1855 = vst [vmem:[%s3239_s12] sm:$0xff] %v1839_v16  ;;  %v1842_v8 = vmul.f32 %v2607_v7, %v3179_v11  ;;  %v1814_v62 = vmax.f32 %v1790_v58, 1e-12 }
 0x2f5   : > { %v1811_v54 = vmax.f32 %v1784_v61, 1e-12  ;;  %v2609_v9 = vpop.eup %2608 }
 0x2f6   : > { %1858 = vst [vmem:[%s3239_s12 + $0x18] sm:$0xff] %v1842_v8  ;;  %v1840_v13 = vmul.f32 %v2609_v9, %v3183_v24  ;;  %2612 = vrsqrt.f32 %v1814_v62 }
 0x2f7   : > { %2614 = vrsqrt.f32 %v1811_v54  ;;  %v1786_v23 = vpop.xlane.xlu1 %1785 }
 0x2f8   : > { %1856 = vst [vmem:[%s3239_s12 + $0x8] sm:$0xff] %v1840_v13  ;;  %v1812_v25 = vmax.f32 %v1786_v23, 1e-12 }
 0x2fa   : > { %2616 = vrsqrt.f32 %v1812_v25 }
 0x2ff   : > { %v2611_v51 = vpop.eup %2610  ;;  %v1796_v15 = vpop.xlane.xlu0 %1795 }
 0x300   : > { %v1845_v18 = vmul.f32 %v2611_v51, %v3189_v26  ;;  %v1817_v11 = vmax.f32 %v1796_v15, 1e-12 }
 0x302   : > { %1861 = vst [vmem:[%s3239_s12 + $0x30] sm:$0xff] %v1845_v18  ;;  %2618 = vrsqrt.f32 %v1817_v11 }
 0x303   : > { %v2613_v29 = vpop.eup %2612  ;;  %v1798_v14 = vpop.xlane.xlu1 %1797 }
 0x304   : > { %v1792_v22 = vpop.xlane.xlu0 %1791  ;;  %v2615_v24 = vpop.eup %2614  ;;  %v1846_v31 = vmul.f32 %v2613_v29, %v3195_v21  ;;  %v1818_v34 = vmax.f32 %v1798_v14, 1e-12 }
 0x305   : > { %v1815_v37 = vmax.f32 %v1792_v22, 1e-12  ;;  %v1843_v33 = vmul.f32 %v2615_v24, %v3191_v32 }
 0x306   : > { %1862 = vst [vmem:[%s3239_s12 + $0x38] sm:$0xff] %v1846_v31  ;;  %2620 = vrsqrt.f32 %v1818_v34 }
 0x307   : > { %v2617_v39 = vpop.eup %2616  ;;  %1859 = vst [vmem:[%s3239_s12 + $0x20] sm:$0xff] %v1843_v33  ;;  %2622 = vrsqrt.f32 %v1815_v37  ;;  %v1794_v26 = vpop.xlane.xlu1 %1793 }
 0x308   : > { %v1844_v56 = vmul.f32 %v2617_v39, %v3197_v28  ;;  %v1816_v42 = vmax.f32 %v1794_v26, 1e-12 }
 0x30a   : > { %1860 = vst [vmem:[%s3239_s12 + $0x28] sm:$0xff] %v1844_v56  ;;  %2624 = vrsqrt.f32 %v1816_v42 }
 0x30f   : > { %v2619_v35 = vpop.eup %2618 }
 0x310   : > { %v1849_v21 = vmul.f32 %v2619_v35, %v3205_v53 }
 0x311   : > { %v1800_v2 = vpop.xlane.xlu0 %1799 }
 0x312   : > { %1865 = vst [vmem:[%s3239_s12 + $0x50] sm:$0xff] %v1849_v21  ;;  %v1819_v46 = vmax.f32 %v1800_v2, 1e-12 }
 0x313   : > { %v2621_v32 = vpop.eup %2620 }
 0x314   : > { %v2623_v47 = vpop.eup %2622  ;;  %v1850_v48 = vmul.f32 %v2621_v32, %v3211_v63  ;;  %2626 = vrsqrt.f32 %v1819_v46 }
 0x315   : > { %v1847_v49 = vmul.f32 %v2623_v47, %v3207_v55  ;;  %v1802_v28 = vpop.xlane.xlu1 %1801  ;;  %v1804_v50 = vpop.xlane.xlu0 %1803 }
 0x316   : > { %1866 = vst [vmem:[%s3239_s12 + $0x58] sm:$0xff] %v1850_v48  ;;  %v1820_v40 = vmax.f32 %v1802_v28, 1e-12  ;;  %v1821_v38 = vmax.f32 %v1804_v50, 1e-12 }
 0x317   : > { %v2625_v20 = vpop.eup %2624  ;;  %1863 = vst [vmem:[%s3239_s12 + $0x40] sm:$0xff] %v1847_v49 }
 0x318   : > { %v1848_v53 = vmul.f32 %v2625_v20, %v3213_v45  ;;  %2628 = vrsqrt.f32 %v1820_v40 }
 0x319   : > { %2630 = vrsqrt.f32 %v1821_v38  ;;  %v1806_v63 = vpop.xlane.xlu1 %1805 }
 0x31a   : > { %1864 = vst [vmem:[%s3239_s12 + $0x48] sm:$0xff] %v1848_v53  ;;  %v1822_v52 = vmax.f32 %v1806_v63, 1e-12 }
 0x31c   : > { %2632 = vrsqrt.f32 %v1822_v52 }
 0x321   : > { %v2627_v55 = vpop.eup %2626 }
 0x322   : > { %v1851_v59 = vmul.f32 %v2627_v55, %v3221_v36 }
 0x324   : > { %1867 = vst [vmem:[%s3239_s12 + $0x60] sm:$0xff] %v1851_v59 }
 0x325   : > { %v2629_v60 = vpop.eup %2628 }
 0x326   : > { %v2631_v0 = vpop.eup %2630  ;;  %v1852_v27 = vmul.f32 %v2629_v60, %v3227_v19 }
 0x327   : > { %v1853_v45 = vmul.f32 %v2631_v0, %v3223_v17 }
 0x328   : > { %1868 = vst [vmem:[%s3239_s12 + $0x68] sm:$0xff] %v1852_v27 }
 0x329   : > { %v2633_v30 = vpop.eup %2632  ;;  %1869 = vst [vmem:[%s3239_s12 + $0x70] sm:$0xff] %v1853_v45 }
 0x32a   : > { %v1854_v36 = vmul.f32 %v2633_v30, %v3229_v57 }
 0x32c   : > { %1870 = vst [vmem:[%s3239_s12 + $0x78] sm:$0xff] %v1854_v36 }
 0x32d   : > { %2727 = shalt.err (!%p2724_p9)
}
 0x32e   : > { %s2728_s24 = scalar_lea.hbm %s3275_s13, 2048  ;;  %s2732_s10 = scalar_lea.hbm %s3327_s5, 4096 }
 0x32f   : > { %p2729_p13 = scmp.ne.s32.totalorder %s3275_s13, %s2728_s24  ;;  %p2733_p4 = scmp.lt.s32.totalorder %s3275_s13, %s3327_s5 }
 0x330   : > { %p2734_p8 = scmp.lt.s32.totalorder %s2732_s10, %s2728_s24 }
 0x331   : > { %p2730_p5 = pnand %p2729_p13, %p3343_p10 }
 0x332   : > { %p2735_p3 = por %p2734_p8, %p2733_p4 }
 0x333   : > { %p2731_p0 = pneg %p2730_p5 }
 0x335   : > { %p2736_p11 = pnand %p2735_p3, %p2731_p0 }
 0x337   : > { %2739 = shalt.err (!%p2736_p11)
}
 0x338   : > { %s2792_s28 = smov 128   ;;  %s2793_s7 = smov 8  }
 0x339   : > { %2467 = dma.vmem_to_hbm [thread:$0]  (%p3343_p10), %s3277_s6, 2048, %s3275_s13, %s1872_s22, %s2792_s28, %s2792_s28, %s2793_s7  }
 0x33a PF: > { %s1900_s9 = sand.u32 1, %s2770_s18   ;;  %p3344_p1 = scmp.ne.s32.totalorder %s3333_s25, 0 }
 0x33b   : > { %p3345_p2 = scmp.ge.s32.totalorder %s2782_s21, 2  ;;  %s1901_s14 = scalar_lea.sflag [#allocation4], %s1900_s9 }
 0x33d   : > { %p2481_p6 = pnand %p3345_p2, %p3344_p1 }
 0x33f   : > { %p2482_p12 = pneg %p2481_p6 }
 0x341   : > { %2765 = dma.done.wait (%p2482_p12), %s1901_s14, 2048  }
 0x342   : > { %2767 = vsyncadd (%p2482_p12), %s1901_s14, 4294965248  ;;  %p19_p7 = scmp.ge.s32.totalorder %s2896_s15, 4   ;;  %s3346_s18 = smov %s2774_s19 }
 0x343   : > { %s3347_s19 = smov %s2778_s20  ;;  %s3348_s20 = smov %s2912_s27 }
 0x344   : > { %s3349_s21 = smov %s2896_s15  ;;  %21 = sbr.rel (!%p19_p7) target bundleno = 6 (0x6), region = 93 }
 0x349   :  { %1906 = vsyncpa [#allocation3], 1 }
 0x34a   :  { %1908 = vsyncpa [#allocation3 + $0x1], 1 }
 0x34b   :  { %1909 = vsyncpa [#allocation6], 1 }
 0x34c   :  { %1910 = vsyncpa [#allocation4], 1 }
 0x34d   :  { %1912 = vsyncpa [#allocation4 + $0x1], 1 }

</bundles_post_ra>
